<compile_context>
chip_gen: v7x
topology: tpu7x:2x2x1
jax: 0.10.0
libtpu: 0.0.40
codegen_flags: <defaults>
</compile_context>

<pallas_src>
import functools

import jax
import jax.numpy as jnp
from jax.experimental import pallas as pl
from jax.experimental.pallas import tpu as pltpu

GROUPS = 16
EPS = 1e-5


def _basic_block_kernel(x_ref, w1_ref, g1_ref, b1_ref, w2_ref, g2_ref, b2_ref,
                        m_ref, mask_ref, out_ref, col_ref, *, width):
    """Fused BasicBlock for one image, channel-major / lane-dense layout.

    x_ref:    [C, H*W]      f32  NCHW image, flattened spatial on the lane axis
    w*_ref:   [Cout, 9*Cin] bf16 conv weights, columns ordered (ky, kx, cin)
    g*_ref:   [Cout, 1]     f32  GroupNorm gamma (column)
    b*_ref:   [Cout, 1]     f32  GroupNorm beta  (column)
    m_ref:    [Cout, Cout]  f32  same-group matrix / (H*W*Cg): channel sums -> group means
    mask_ref: [9, H*W]      f32  per-tap edge validity mask (1 = in bounds, 0 = padding)
    out_ref:  [Cout, H*W]   f32  result, NCHW layout (dense lanes)
    col_ref:  [9*Cin, H*W]  bf16 im2col slab (row block per tap)
    """
    C, HW = x_ref.shape

    def build_cols(act):
        # act: [C, HW] f32.  Tap (ky,kx) needs act at flattened index p + (ky-1)*W + (kx-1);
        # a static lane shift + edge zero-mask builds it without any halo buffer.
        for t in range(9):
            ky, kx = divmod(t, 3)
            off = (ky - 1) * width + (kx - 1)
            tap = act if off == 0 else jnp.roll(act, -off, axis=1)
            if off != 0 or ky != 1 or kx != 1:
                tap = tap * mask_ref[t:t + 1, :]
            col_ref[t * C:(t + 1) * C, :] = tap.astype(col_ref.dtype)

    def conv_gn(w_ref, g_ref, b_ref):
        # single K=9*Cin bf16 matmul on the MXU, f32 accumulation, [Cout, HW] output
        z = jnp.dot(w_ref[...], col_ref[...],
                    preferred_element_type=jnp.float32)              # [Cout, HW]
        # GroupNorm(16): centered (two-pass) biased variance, like PyTorch
        s = jnp.sum(z, axis=1, keepdims=True)                        # [Cout, 1]
        mean = jnp.dot(m_ref[...], s,
                       preferred_element_type=jnp.float32)           # [Cout, 1] group means
        d = z - mean
        var = jnp.dot(m_ref[...], jnp.sum(d * d, axis=1, keepdims=True),
                      preferred_element_type=jnp.float32)            # [Cout, 1] group vars
        scale = jax.lax.rsqrt(var + EPS) * g_ref[...]                # fused per-channel affine
        return d * scale + b_ref[...]                                # [Cout, HW]

    x = x_ref[...]                                                   # stays resident for residual

    # ---- stage 1: relu(gn1(conv1(x))) ------------------------------------
    build_cols(x)
    h1 = jnp.maximum(conv_gn(w1_ref, g1_ref, b1_ref), 0.0)           # [C, HW], never leaves VMEM

    # ---- stage 2: relu(gn2(conv2(h1)) + identity) -------------------------
    build_cols(h1)
    y2 = conv_gn(w2_ref, g2_ref, b2_ref)

    out_ref[...] = jnp.maximum(y2 + x, 0.0).astype(out_ref.dtype)    # lane-dense 256-wide store


def _group_matrix(C, HW):
    """M[i, j] = 1/(HW*Cg) if channels i, j share a GroupNorm group, else 0."""
    Cg = C // GROUPS
    idx = jnp.arange(C)
    same = (idx[:, None] // Cg) == (idx[None, :] // Cg)
    return same.astype(jnp.float32) / float(HW * Cg)


def _tap_masks(H, W):
    """mask[t, p] = 1 iff pixel p shifted by tap t's (dy, dx) stays inside the image."""
    p = jnp.arange(H * W)
    y, x = p // W, p % W
    rows = []
    for t in range(9):
        ky, kx = divmod(t, 3)
        dy, dx = ky - 1, kx - 1
        valid = (y + dy >= 0) & (y + dy < H) & (x + dx >= 0) & (x + dx < W)
        rows.append(valid)
    return jnp.stack(rows).astype(jnp.float32)          # [9, H*W]


@jax.jit
def basic_block_forward(x_nchw, params):
    """BasicBlock forward, default config (stride=1, downsample=None, inplanes==planes)."""
    w1t, g1, b1, w2t, g2, b2 = params                    # w*t: [Cout, 9*Cin] bf16, g/b: [Cout, 1]
    N, C, H, W = x_nchw.shape
    Cout = w1t.shape[0]
    assert C == Cout and C % GROUPS == 0  # TODO(synk): downsample / resize paths unsupported
    HW = H * W

    x2d = x_nchw.reshape(N, C, HW)                       # free reshape, contiguous
    m = _group_matrix(Cout, HW)
    masks = _tap_masks(H, W)

    kernel = functools.partial(_basic_block_kernel, width=W)

    out = pl.pallas_call(
        kernel,
        out_shape=jax.ShapeDtypeStruct((N, Cout, HW), jnp.float32),
        grid_spec=pltpu.PrefetchScalarGridSpec(
            num_scalar_prefetch=0,
            grid=(N,),
            in_specs=[
                pl.BlockSpec((None, C, HW), lambda n: (n, 0, 0)),     # x (per image)
                pl.BlockSpec((Cout, 9 * C), lambda n: (0, 0)),        # w1^T (bf16)
                pl.BlockSpec((Cout, 1), lambda n: (0, 0)),            # gamma1
                pl.BlockSpec((Cout, 1), lambda n: (0, 0)),            # beta1
                pl.BlockSpec((Cout, 9 * Cout), lambda n: (0, 0)),     # w2^T (bf16)
                pl.BlockSpec((Cout, 1), lambda n: (0, 0)),            # gamma2
                pl.BlockSpec((Cout, 1), lambda n: (0, 0)),            # beta2
                pl.BlockSpec((Cout, Cout), lambda n: (0, 0)),         # group matrix
                pl.BlockSpec((9, HW), lambda n: (0, 0)),              # tap edge masks
            ],
            out_specs=pl.BlockSpec((None, Cout, HW), lambda n: (n, 0, 0)),
            scratch_shapes=[
                pltpu.VMEM((9 * C, HW), jnp.bfloat16),                # im2col slab, bf16
            ],
        ),
        compiler_params=pltpu.CompilerParams(
            dimension_semantics=("parallel",),   # per-image grid points are independent
        ),
    )(x2d, w1t, g1, b1, w2t, g2, b2, m, masks)

    return out.reshape(N, Cout, H, W)


# ------------------------- pure-JAX reference (for verification) -------------------------
def _gn_ref(x_nhwc, gamma, beta):
    N, H, W, C = x_nhwc.shape
    xg = x_nhwc.reshape(N, H, W, GROUPS, C // GROUPS)
    mean = xg.mean(axis=(1, 2, 4), keepdims=True)
    var = xg.var(axis=(1, 2, 4), keepdims=True)
    y = ((xg - mean) / jnp.sqrt(var + EPS)).reshape(N, H, W, C)
    return y * gamma.reshape(1, 1, 1, C) + beta.reshape(1, 1, 1, C)


def _conv_ref(x_nhwc, w_hwio):
    # Mirror the kernel's numerics: bf16 operands, f32 accumulation.
    return jax.lax.conv_general_dilated(
        x_nhwc.astype(jnp.bfloat16), w_hwio.astype(jnp.bfloat16),
        window_strides=(1, 1), padding="SAME",
        dimension_numbers=("NHWC", "HWIO", "NHWC"),
        preferred_element_type=jnp.float32)


def basic_block_ref(x_nchw, w1_hwio, g1, b1, w2_hwio, g2, b2):
    x = jnp.transpose(x_nchw, (0, 2, 3, 1))
    h = jnp.maximum(_gn_ref(_conv_ref(x, w1_hwio), g1, b1), 0.0)
    out = _gn_ref(_conv_ref(h, w2_hwio), g2, b2)
    out = jnp.maximum(out + x, 0.0)
    return jnp.transpose(out, (0, 3, 1, 2))


if __name__ == "__main__":
    key = jax.random.PRNGKey(0)
    k_x, k_w1, k_w2, k_g1, k_b1, k_g2, k_b2 = jax.random.split(key, 7)

    N, C, H, W = 2, 32, 16, 16        # inplanes = planes = 32 (divisible by 16 groups)
    planes = C

    x = jax.random.normal(k_x, (N, C, H, W), jnp.float32)

    # conv weights created in HWIO (for the reference), pre-transposed + bf16 for the kernel:
    # [3,3,Cin,Cout] -> [9*Cin, Cout] (rows ordered ky,kx,cin) -> [Cout, 9*Cin]
    w1_hwio = jax.random.normal(k_w1, (3, 3, C, planes), jnp.float32) * 0.05
    w2_hwio = jax.random.normal(k_w2, (3, 3, planes, planes), jnp.float32) * 0.05
    w1_t = jnp.transpose(w1_hwio.reshape(9 * C, planes)).astype(jnp.bfloat16)
    w2_t = jnp.transpose(w2_hwio.reshape(9 * planes, planes)).astype(jnp.bfloat16)

    g1 = (1.0 + 0.1 * jax.random.normal(k_g1, (planes,))).astype(jnp.float32)
    b1 = (0.1 * jax.random.normal(k_b1, (planes,))).astype(jnp.float32)
    g2 = (1.0 + 0.1 * jax.random.normal(k_g2, (planes,))).astype(jnp.float32)
    b2 = (0.1 * jax.random.normal(k_b2, (planes,))).astype(jnp.float32)

    params = (w1_t, g1.reshape(planes, 1), b1.reshape(planes, 1),
              w2_t, g2.reshape(planes, 1), b2.reshape(planes, 1))

    out = basic_block_forward(x, params)
    out = jax.block_until_ready(out)

    ref = basic_block_ref(x, w1_hwio, g1, b1, w2_hwio, g2, b2)
    assert out.shape == (N, planes, H, W)
    max_err = float(jnp.max(jnp.abs(out - ref)))
    assert jnp.allclose(out, ref, rtol=5e-3, atol=5e-3), f"mismatch vs reference (max err {max_err})"

    print("KERNEL_OK")
</pallas_src>

<mosaic_0001>
module attributes {stable_mosaic.version = 11 : i64} {
  func.func @_basic_block_kernel(%arg0: i32, %arg1: memref<1x32x256xf32, #tpu.memory_space<vmem>>, %arg2: memref<32x288xbf16, #tpu.memory_space<vmem>>, %arg3: memref<32x1xf32, #tpu.memory_space<vmem>>, %arg4: memref<32x1xf32, #tpu.memory_space<vmem>>, %arg5: memref<32x288xbf16, #tpu.memory_space<vmem>>, %arg6: memref<32x1xf32, #tpu.memory_space<vmem>>, %arg7: memref<32x1xf32, #tpu.memory_space<vmem>>, %arg8: memref<32x32xf32, #tpu.memory_space<vmem>>, %arg9: memref<9x256xf32, #tpu.memory_space<vmem>>, %arg10: memref<1x32x256xf32, #tpu.memory_space<vmem>>, %arg11: memref<288x256xbf16, #tpu.memory_space<vmem>>) attributes {dimension_semantics = [#tpu.dimension_semantics<parallel>], iteration_bounds = array<i64: 2>, scalar_prefetch = 0 : i64, scratch_operands = 1 : i64, tpu.core_type = #tpu.core_type<tc>, window_params = [{transform_indices = @transform_0, window_bounds = array<i64: 1, 32, 256>}, {pipeline_mode = #tpu.pipeline_mode<synchronous>, transform_indices = @transform_1, window_bounds = array<i64: 32, 288>}, {pipeline_mode = #tpu.pipeline_mode<synchronous>, transform_indices = @transform_2, window_bounds = array<i64: 32, 1>}, {pipeline_mode = #tpu.pipeline_mode<synchronous>, transform_indices = @transform_3, window_bounds = array<i64: 32, 1>}, {pipeline_mode = #tpu.pipeline_mode<synchronous>, transform_indices = @transform_4, window_bounds = array<i64: 32, 288>}, {pipeline_mode = #tpu.pipeline_mode<synchronous>, transform_indices = @transform_5, window_bounds = array<i64: 32, 1>}, {pipeline_mode = #tpu.pipeline_mode<synchronous>, transform_indices = @transform_6, window_bounds = array<i64: 32, 1>}, {pipeline_mode = #tpu.pipeline_mode<synchronous>, transform_indices = @transform_7, window_bounds = array<i64: 32, 32>}, {pipeline_mode = #tpu.pipeline_mode<synchronous>, transform_indices = @transform_8, window_bounds = array<i64: 9, 256>}, {transform_indices = @transform_9, window_bounds = array<i64: 1, 32, 256>}]} {
    %c0 = arith.constant 0 : index
    %c0_0 = arith.constant 0 : index
    %c0_1 = arith.constant 0 : index
    %0 = vector.load %arg1[%c0, %c0_0, %c0_1] : memref<1x32x256xf32, #tpu.memory_space<vmem>>, vector<1x32x256xf32>
    %1 = vector.shape_cast %0 : vector<1x32x256xf32> to vector<32x256xf32>
    %2 = vector.extract_strided_slice %1 {offsets = [0, 239], sizes = [32, 17], strides = [1, 1]} : vector<32x256xf32> to vector<32x17xf32>
    %3 = vector.extract_strided_slice %1 {offsets = [0, 0], sizes = [32, 239], strides = [1, 1]} : vector<32x256xf32> to vector<32x239xf32>
    %4 = tpu.concatenate %2, %3 in 1 : vector<32x17xf32>, vector<32x239xf32> -> vector<32x256xf32>
    %c0_2 = arith.constant 0 : index
    %c0_3 = arith.constant 0 : index
    %5 = vector.load %arg9[%c0_2, %c0_3] : memref<9x256xf32, #tpu.memory_space<vmem>>, vector<1x256xf32>
    %6 = vector.broadcast %5 : vector<1x256xf32> to vector<32x256xf32>
    %7 = arith.mulf %4, %6 : vector<32x256xf32>
    %8 = arith.truncf %7 : vector<32x256xf32> to vector<32x256xbf16>
    %c0_4 = arith.constant 0 : index
    %c0_5 = arith.constant 0 : index
    %9 = vector.load %arg11[%c0_4, %c0_5] : memref<288x256xbf16, #tpu.memory_space<vmem>>, vector<32x256xbf16>
    tpu.vector_store %arg11[%c0_4, %c0_5], %8 {strides = array<i32>} : memref<288x256xbf16, #tpu.memory_space<vmem>>, vector<32x256xbf16>,
    %10 = vector.extract_strided_slice %1 {offsets = [0, 240], sizes = [32, 16], strides = [1, 1]} : vector<32x256xf32> to vector<32x16xf32>
    %11 = vector.extract_strided_slice %1 {offsets = [0, 0], sizes = [32, 240], strides = [1, 1]} : vector<32x256xf32> to vector<32x240xf32>
    %12 = tpu.concatenate %10, %11 in 1 : vector<32x16xf32>, vector<32x240xf32> -> vector<32x256xf32>
    %c1 = arith.constant 1 : index
    %c0_6 = arith.constant 0 : index
    %13 = vector.load %arg9[%c1, %c0_6] : memref<9x256xf32, #tpu.memory_space<vmem>>, vector<1x256xf32>
    %14 = vector.broadcast %13 : vector<1x256xf32> to vector<32x256xf32>
    %15 = arith.mulf %12, %14 : vector<32x256xf32>
    %16 = arith.truncf %15 : vector<32x256xf32> to vector<32x256xbf16>
    %c32 = arith.constant 32 : index
    %c0_7 = arith.constant 0 : index
    %17 = vector.load %arg11[%c32, %c0_7] : memref<288x256xbf16, #tpu.memory_space<vmem>>, vector<32x256xbf16>
    tpu.vector_store %arg11[%c32, %c0_7], %16 {strides = array<i32>} : memref<288x256xbf16, #tpu.memory_space<vmem>>, vector<32x256xbf16>,
    %18 = vector.extract_strided_slice %1 {offsets = [0, 241], sizes = [32, 15], strides = [1, 1]} : vector<32x256xf32> to vector<32x15xf32>
    %19 = vector.extract_strided_slice %1 {offsets = [0, 0], sizes = [32, 241], strides = [1, 1]} : vector<32x256xf32> to vector<32x241xf32>
    %20 = tpu.concatenate %18, %19 in 1 : vector<32x15xf32>, vector<32x241xf32> -> vector<32x256xf32>
    %c2 = arith.constant 2 : index
    %c0_8 = arith.constant 0 : index
    %21 = vector.load %arg9[%c2, %c0_8] : memref<9x256xf32, #tpu.memory_space<vmem>>, vector<1x256xf32>
    %22 = vector.broadcast %21 : vector<1x256xf32> to vector<32x256xf32>
    %23 = arith.mulf %20, %22 : vector<32x256xf32>
    %24 = arith.truncf %23 : vector<32x256xf32> to vector<32x256xbf16>
    %c64 = arith.constant 64 : index
    %c0_9 = arith.constant 0 : index
    %25 = vector.load %arg11[%c64, %c0_9] : memref<288x256xbf16, #tpu.memory_space<vmem>>, vector<32x256xbf16>
    tpu.vector_store %arg11[%c64, %c0_9], %24 {strides = array<i32>} : memref<288x256xbf16, #tpu.memory_space<vmem>>, vector<32x256xbf16>,
    %26 = vector.extract_strided_slice %1 {offsets = [0, 255], sizes = [32, 1], strides = [1, 1]} : vector<32x256xf32> to vector<32x1xf32>
    %27 = vector.extract_strided_slice %1 {offsets = [0, 0], sizes = [32, 255], strides = [1, 1]} : vector<32x256xf32> to vector<32x255xf32>
    %28 = tpu.concatenate %26, %27 in 1 : vector<32x1xf32>, vector<32x255xf32> -> vector<32x256xf32>
    %c3 = arith.constant 3 : index
    %c0_10 = arith.constant 0 : index
    %29 = vector.load %arg9[%c3, %c0_10] : memref<9x256xf32, #tpu.memory_space<vmem>>, vector<1x256xf32>
    %30 = vector.broadcast %29 : vector<1x256xf32> to vector<32x256xf32>
    %31 = arith.mulf %28, %30 : vector<32x256xf32>
    %32 = arith.truncf %31 : vector<32x256xf32> to vector<32x256xbf16>
    %c96 = arith.constant 96 : index
    %c0_11 = arith.constant 0 : index
    %33 = vector.load %arg11[%c96, %c0_11] : memref<288x256xbf16, #tpu.memory_space<vmem>>, vector<32x256xbf16>
    tpu.vector_store %arg11[%c96, %c0_11], %32 {strides = array<i32>} : memref<288x256xbf16, #tpu.memory_space<vmem>>, vector<32x256xbf16>,
    %34 = arith.truncf %1 : vector<32x256xf32> to vector<32x256xbf16>
    %c128 = arith.constant 128 : index
    %c0_12 = arith.constant 0 : index
    %35 = vector.load %arg11[%c128, %c0_12] : memref<288x256xbf16, #tpu.memory_space<vmem>>, vector<32x256xbf16>
    tpu.vector_store %arg11[%c128, %c0_12], %34 {strides = array<i32>} : memref<288x256xbf16, #tpu.memory_space<vmem>>, vector<32x256xbf16>,
    %36 = vector.extract_strided_slice %1 {offsets = [0, 1], sizes = [32, 255], strides = [1, 1]} : vector<32x256xf32> to vector<32x255xf32>
    %37 = vector.extract_strided_slice %1 {offsets = [0, 0], sizes = [32, 1], strides = [1, 1]} : vector<32x256xf32> to vector<32x1xf32>
    %38 = tpu.concatenate %36, %37 in 1 : vector<32x255xf32>, vector<32x1xf32> -> vector<32x256xf32>
    %c5 = arith.constant 5 : index
    %c0_13 = arith.constant 0 : index
    %39 = vector.load %arg9[%c5, %c0_13] : memref<9x256xf32, #tpu.memory_space<vmem>>, vector<1x256xf32>
    %40 = vector.broadcast %39 : vector<1x256xf32> to vector<32x256xf32>
    %41 = arith.mulf %38, %40 : vector<32x256xf32>
    %42 = arith.truncf %41 : vector<32x256xf32> to vector<32x256xbf16>
    %c160 = arith.constant 160 : index
    %c0_14 = arith.constant 0 : index
    %43 = vector.load %arg11[%c160, %c0_14] : memref<288x256xbf16, #tpu.memory_space<vmem>>, vector<32x256xbf16>
    tpu.vector_store %arg11[%c160, %c0_14], %42 {strides = array<i32>} : memref<288x256xbf16, #tpu.memory_space<vmem>>, vector<32x256xbf16>,
    %44 = vector.extract_strided_slice %1 {offsets = [0, 15], sizes = [32, 241], strides = [1, 1]} : vector<32x256xf32> to vector<32x241xf32>
    %45 = vector.extract_strided_slice %1 {offsets = [0, 0], sizes = [32, 15], strides = [1, 1]} : vector<32x256xf32> to vector<32x15xf32>
    %46 = tpu.concatenate %44, %45 in 1 : vector<32x241xf32>, vector<32x15xf32> -> vector<32x256xf32>
    %c6 = arith.constant 6 : index
    %c0_15 = arith.constant 0 : index
    %47 = vector.load %arg9[%c6, %c0_15] : memref<9x256xf32, #tpu.memory_space<vmem>>, vector<1x256xf32>
    %48 = vector.broadcast %47 : vector<1x256xf32> to vector<32x256xf32>
    %49 = arith.mulf %46, %48 : vector<32x256xf32>
    %50 = arith.truncf %49 : vector<32x256xf32> to vector<32x256xbf16>
    %c192 = arith.constant 192 : index
    %c0_16 = arith.constant 0 : index
    %51 = vector.load %arg11[%c192, %c0_16] : memref<288x256xbf16, #tpu.memory_space<vmem>>, vector<32x256xbf16>
    tpu.vector_store %arg11[%c192, %c0_16], %50 {strides = array<i32>} : memref<288x256xbf16, #tpu.memory_space<vmem>>, vector<32x256xbf16>,
    %52 = vector.extract_strided_slice %1 {offsets = [0, 16], sizes = [32, 240], strides = [1, 1]} : vector<32x256xf32> to vector<32x240xf32>
    %53 = vector.extract_strided_slice %1 {offsets = [0, 0], sizes = [32, 16], strides = [1, 1]} : vector<32x256xf32> to vector<32x16xf32>
    %54 = tpu.concatenate %52, %53 in 1 : vector<32x240xf32>, vector<32x16xf32> -> vector<32x256xf32>
    %c7 = arith.constant 7 : index
    %c0_17 = arith.constant 0 : index
    %55 = vector.load %arg9[%c7, %c0_17] : memref<9x256xf32, #tpu.memory_space<vmem>>, vector<1x256xf32>
    %56 = vector.broadcast %55 : vector<1x256xf32> to vector<32x256xf32>
    %57 = arith.mulf %54, %56 : vector<32x256xf32>
    %58 = arith.truncf %57 : vector<32x256xf32> to vector<32x256xbf16>
    %c224 = arith.constant 224 : index
    %c0_18 = arith.constant 0 : index
    %59 = vector.load %arg11[%c224, %c0_18] : memref<288x256xbf16, #tpu.memory_space<vmem>>, vector<32x256xbf16>
    tpu.vector_store %arg11[%c224, %c0_18], %58 {strides = array<i32>} : memref<288x256xbf16, #tpu.memory_space<vmem>>, vector<32x256xbf16>,
    %60 = vector.extract_strided_slice %1 {offsets = [0, 17], sizes = [32, 239], strides = [1, 1]} : vector<32x256xf32> to vector<32x239xf32>
    %61 = vector.extract_strided_slice %1 {offsets = [0, 0], sizes = [32, 17], strides = [1, 1]} : vector<32x256xf32> to vector<32x17xf32>
    %62 = tpu.concatenate %60, %61 in 1 : vector<32x239xf32>, vector<32x17xf32> -> vector<32x256xf32>
    %c8 = arith.constant 8 : index
    %c0_19 = arith.constant 0 : index
    %63 = vector.load %arg9[%c8, %c0_19] : memref<9x256xf32, #tpu.memory_space<vmem>>, vector<1x256xf32>
    %64 = vector.broadcast %63 : vector<1x256xf32> to vector<32x256xf32>
    %65 = arith.mulf %62, %64 : vector<32x256xf32>
    %66 = arith.truncf %65 : vector<32x256xf32> to vector<32x256xbf16>
    %c256 = arith.constant 256 : index
    %c0_20 = arith.constant 0 : index
    %67 = vector.load %arg11[%c256, %c0_20] : memref<288x256xbf16, #tpu.memory_space<vmem>>, vector<32x256xbf16>
    tpu.vector_store %arg11[%c256, %c0_20], %66 {strides = array<i32>} : memref<288x256xbf16, #tpu.memory_space<vmem>>, vector<32x256xbf16>,
    %c0_21 = arith.constant 0 : index
    %c0_22 = arith.constant 0 : index
    %68 = vector.load %arg2[%c0_21, %c0_22] : memref<32x288xbf16, #tpu.memory_space<vmem>>, vector<32x288xbf16>
    %c0_23 = arith.constant 0 : index
    %c0_24 = arith.constant 0 : index
    %69 = vector.load %arg11[%c0_23, %c0_24] : memref<288x256xbf16, #tpu.memory_space<vmem>>, vector<288x256xbf16>
    %cst = arith.constant dense<0.000000e+00> : vector<32x256xf32>
    %70 = tpu.matmul %68, %69, %cst {dimension_numbers = #tpu.dot_dimension_numbers<[1], [0], [0], [1], [0, 0, 1, 1], [], []>} : vector<32x288xbf16>, vector<288x256xbf16>, vector<32x256xf32> -> vector<32x256xf32>
    %cst_25 = arith.constant dense<0.000000e+00> : vector<32xf32>
    %71 = vector.multi_reduction <add>, %70, %cst_25 [1] : vector<32x256xf32> to vector<32xf32>
    %72 = vector.shape_cast %71 : vector<32xf32> to vector<32x1xf32>
    %c0_26 = arith.constant 0 : index
    %c0_27 = arith.constant 0 : index
    %73 = vector.load %arg8[%c0_26, %c0_27] : memref<32x32xf32, #tpu.memory_space<vmem>>, vector<32x32xf32>
    %cst_28 = arith.constant dense<0.000000e+00> : vector<32x1xf32>
    %74 = tpu.matmul %73, %72, %cst_28 {dimension_numbers = #tpu.dot_dimension_numbers<[1], [0], [0], [1], [0, 0, 1, 1], [], []>} : vector<32x32xf32>, vector<32x1xf32>, vector<32x1xf32> -> vector<32x1xf32>
    %75 = vector.broadcast %74 : vector<32x1xf32> to vector<32x256xf32>
    %76 = arith.subf %70, %75 : vector<32x256xf32>
    %c0_29 = arith.constant 0 : index
    %c0_30 = arith.constant 0 : index
    %77 = vector.load %arg8[%c0_29, %c0_30] : memref<32x32xf32, #tpu.memory_space<vmem>>, vector<32x32xf32>
    %78 = arith.mulf %76, %76 : vector<32x256xf32>
    %cst_31 = arith.constant dense<0.000000e+00> : vector<32xf32>
    %79 = vector.multi_reduction <add>, %78, %cst_31 [1] : vector<32x256xf32> to vector<32xf32>
    %80 = vector.shape_cast %79 : vector<32xf32> to vector<32x1xf32>
    %cst_32 = arith.constant dense<0.000000e+00> : vector<32x1xf32>
    %81 = tpu.matmul %77, %80, %cst_32 {dimension_numbers = #tpu.dot_dimension_numbers<[1], [0], [0], [1], [0, 0, 1, 1], [], []>} : vector<32x32xf32>, vector<32x1xf32>, vector<32x1xf32> -> vector<32x1xf32>
    %cst_33 = arith.constant 9.99999974E-6 : f32
    %82 = vector.broadcast %cst_33 : f32 to vector<32x1xf32>
    %83 = arith.addf %81, %82 : vector<32x1xf32>
    %84 = math.rsqrt %83 : vector<32x1xf32>
    %c0_34 = arith.constant 0 : index
    %c0_35 = arith.constant 0 : index
    %85 = vector.load %arg3[%c0_34, %c0_35] : memref<32x1xf32, #tpu.memory_space<vmem>>, vector<32x1xf32>
    %86 = arith.mulf %84, %85 : vector<32x1xf32>
    %87 = vector.broadcast %86 : vector<32x1xf32> to vector<32x256xf32>
    %88 = arith.mulf %76, %87 : vector<32x256xf32>
    %c0_36 = arith.constant 0 : index
    %c0_37 = arith.constant 0 : index
    %89 = vector.load %arg4[%c0_36, %c0_37] : memref<32x1xf32, #tpu.memory_space<vmem>>, vector<32x1xf32>
    %90 = vector.broadcast %89 : vector<32x1xf32> to vector<32x256xf32>
    %91 = arith.addf %88, %90 : vector<32x256xf32>
    %cst_38 = arith.constant 0.000000e+00 : f32
    %92 = vector.broadcast %cst_38 : f32 to vector<32x256xf32>
    %93 = arith.maximumf %91, %92 : vector<32x256xf32>
    %94 = vector.extract_strided_slice %93 {offsets = [0, 239], sizes = [32, 17], strides = [1, 1]} : vector<32x256xf32> to vector<32x17xf32>
    %95 = vector.extract_strided_slice %93 {offsets = [0, 0], sizes = [32, 239], strides = [1, 1]} : vector<32x256xf32> to vector<32x239xf32>
    %96 = tpu.concatenate %94, %95 in 1 : vector<32x17xf32>, vector<32x239xf32> -> vector<32x256xf32>
    %c0_39 = arith.constant 0 : index
    %c0_40 = arith.constant 0 : index
    %97 = vector.load %arg9[%c0_39, %c0_40] : memref<9x256xf32, #tpu.memory_space<vmem>>, vector<1x256xf32>
    %98 = vector.broadcast %97 : vector<1x256xf32> to vector<32x256xf32>
    %99 = arith.mulf %96, %98 : vector<32x256xf32>
    %100 = arith.truncf %99 : vector<32x256xf32> to vector<32x256xbf16>
    %c0_41 = arith.constant 0 : index
    %c0_42 = arith.constant 0 : index
    %101 = vector.load %arg11[%c0_41, %c0_42] : memref<288x256xbf16, #tpu.memory_space<vmem>>, vector<32x256xbf16>
    tpu.vector_store %arg11[%c0_41, %c0_42], %100 {strides = array<i32>} : memref<288x256xbf16, #tpu.memory_space<vmem>>, vector<32x256xbf16>,
    %102 = vector.extract_strided_slice %93 {offsets = [0, 240], sizes = [32, 16], strides = [1, 1]} : vector<32x256xf32> to vector<32x16xf32>
    %103 = vector.extract_strided_slice %93 {offsets = [0, 0], sizes = [32, 240], strides = [1, 1]} : vector<32x256xf32> to vector<32x240xf32>
    %104 = tpu.concatenate %102, %103 in 1 : vector<32x16xf32>, vector<32x240xf32> -> vector<32x256xf32>
    %c1_43 = arith.constant 1 : index
    %c0_44 = arith.constant 0 : index
    %105 = vector.load %arg9[%c1_43, %c0_44] : memref<9x256xf32, #tpu.memory_space<vmem>>, vector<1x256xf32>
    %106 = vector.broadcast %105 : vector<1x256xf32> to vector<32x256xf32>
    %107 = arith.mulf %104, %106 : vector<32x256xf32>
    %108 = arith.truncf %107 : vector<32x256xf32> to vector<32x256xbf16>
    %c32_45 = arith.constant 32 : index
    %c0_46 = arith.constant 0 : index
    %109 = vector.load %arg11[%c32_45, %c0_46] : memref<288x256xbf16, #tpu.memory_space<vmem>>, vector<32x256xbf16>
    tpu.vector_store %arg11[%c32_45, %c0_46], %108 {strides = array<i32>} : memref<288x256xbf16, #tpu.memory_space<vmem>>, vector<32x256xbf16>,
    %110 = vector.extract_strided_slice %93 {offsets = [0, 241], sizes = [32, 15], strides = [1, 1]} : vector<32x256xf32> to vector<32x15xf32>
    %111 = vector.extract_strided_slice %93 {offsets = [0, 0], sizes = [32, 241], strides = [1, 1]} : vector<32x256xf32> to vector<32x241xf32>
    %112 = tpu.concatenate %110, %111 in 1 : vector<32x15xf32>, vector<32x241xf32> -> vector<32x256xf32>
    %c2_47 = arith.constant 2 : index
    %c0_48 = arith.constant 0 : index
    %113 = vector.load %arg9[%c2_47, %c0_48] : memref<9x256xf32, #tpu.memory_space<vmem>>, vector<1x256xf32>
    %114 = vector.broadcast %113 : vector<1x256xf32> to vector<32x256xf32>
    %115 = arith.mulf %112, %114 : vector<32x256xf32>
    %116 = arith.truncf %115 : vector<32x256xf32> to vector<32x256xbf16>
    %c64_49 = arith.constant 64 : index
    %c0_50 = arith.constant 0 : index
    %117 = vector.load %arg11[%c64_49, %c0_50] : memref<288x256xbf16, #tpu.memory_space<vmem>>, vector<32x256xbf16>
    tpu.vector_store %arg11[%c64_49, %c0_50], %116 {strides = array<i32>} : memref<288x256xbf16, #tpu.memory_space<vmem>>, vector<32x256xbf16>,
    %118 = vector.extract_strided_slice %93 {offsets = [0, 255], sizes = [32, 1], strides = [1, 1]} : vector<32x256xf32> to vector<32x1xf32>
    %119 = vector.extract_strided_slice %93 {offsets = [0, 0], sizes = [32, 255], strides = [1, 1]} : vector<32x256xf32> to vector<32x255xf32>
    %120 = tpu.concatenate %118, %119 in 1 : vector<32x1xf32>, vector<32x255xf32> -> vector<32x256xf32>
    %c3_51 = arith.constant 3 : index
    %c0_52 = arith.constant 0 : index
    %121 = vector.load %arg9[%c3_51, %c0_52] : memref<9x256xf32, #tpu.memory_space<vmem>>, vector<1x256xf32>
    %122 = vector.broadcast %121 : vector<1x256xf32> to vector<32x256xf32>
    %123 = arith.mulf %120, %122 : vector<32x256xf32>
    %124 = arith.truncf %123 : vector<32x256xf32> to vector<32x256xbf16>
    %c96_53 = arith.constant 96 : index
    %c0_54 = arith.constant 0 : index
    %125 = vector.load %arg11[%c96_53, %c0_54] : memref<288x256xbf16, #tpu.memory_space<vmem>>, vector<32x256xbf16>
    tpu.vector_store %arg11[%c96_53, %c0_54], %124 {strides = array<i32>} : memref<288x256xbf16, #tpu.memory_space<vmem>>, vector<32x256xbf16>,
    %126 = arith.truncf %93 : vector<32x256xf32> to vector<32x256xbf16>
    %c128_55 = arith.constant 128 : index
    %c0_56 = arith.constant 0 : index
    %127 = vector.load %arg11[%c128_55, %c0_56] : memref<288x256xbf16, #tpu.memory_space<vmem>>, vector<32x256xbf16>
    tpu.vector_store %arg11[%c128_55, %c0_56], %126 {strides = array<i32>} : memref<288x256xbf16, #tpu.memory_space<vmem>>, vector<32x256xbf16>,
    %128 = vector.extract_strided_slice %93 {offsets = [0, 1], sizes = [32, 255], strides = [1, 1]} : vector<32x256xf32> to vector<32x255xf32>
    %129 = vector.extract_strided_slice %93 {offsets = [0, 0], sizes = [32, 1], strides = [1, 1]} : vector<32x256xf32> to vector<32x1xf32>
    %130 = tpu.concatenate %128, %129 in 1 : vector<32x255xf32>, vector<32x1xf32> -> vector<32x256xf32>
    %c5_57 = arith.constant 5 : index
    %c0_58 = arith.constant 0 : index
    %131 = vector.load %arg9[%c5_57, %c0_58] : memref<9x256xf32, #tpu.memory_space<vmem>>, vector<1x256xf32>
    %132 = vector.broadcast %131 : vector<1x256xf32> to vector<32x256xf32>
    %133 = arith.mulf %130, %132 : vector<32x256xf32>
    %134 = arith.truncf %133 : vector<32x256xf32> to vector<32x256xbf16>
    %c160_59 = arith.constant 160 : index
    %c0_60 = arith.constant 0 : index
    %135 = vector.load %arg11[%c160_59, %c0_60] : memref<288x256xbf16, #tpu.memory_space<vmem>>, vector<32x256xbf16>
    tpu.vector_store %arg11[%c160_59, %c0_60], %134 {strides = array<i32>} : memref<288x256xbf16, #tpu.memory_space<vmem>>, vector<32x256xbf16>,
    %136 = vector.extract_strided_slice %93 {offsets = [0, 15], sizes = [32, 241], strides = [1, 1]} : vector<32x256xf32> to vector<32x241xf32>
    %137 = vector.extract_strided_slice %93 {offsets = [0, 0], sizes = [32, 15], strides = [1, 1]} : vector<32x256xf32> to vector<32x15xf32>
    %138 = tpu.concatenate %136, %137 in 1 : vector<32x241xf32>, vector<32x15xf32> -> vector<32x256xf32>
    %c6_61 = arith.constant 6 : index
    %c0_62 = arith.constant 0 : index
    %139 = vector.load %arg9[%c6_61, %c0_62] : memref<9x256xf32, #tpu.memory_space<vmem>>, vector<1x256xf32>
    %140 = vector.broadcast %139 : vector<1x256xf32> to vector<32x256xf32>
    %141 = arith.mulf %138, %140 : vector<32x256xf32>
    %142 = arith.truncf %141 : vector<32x256xf32> to vector<32x256xbf16>
    %c192_63 = arith.constant 192 : index
    %c0_64 = arith.constant 0 : index
    %143 = vector.load %arg11[%c192_63, %c0_64] : memref<288x256xbf16, #tpu.memory_space<vmem>>, vector<32x256xbf16>
    tpu.vector_store %arg11[%c192_63, %c0_64], %142 {strides = array<i32>} : memref<288x256xbf16, #tpu.memory_space<vmem>>, vector<32x256xbf16>,
    %144 = vector.extract_strided_slice %93 {offsets = [0, 16], sizes = [32, 240], strides = [1, 1]} : vector<32x256xf32> to vector<32x240xf32>
    %145 = vector.extract_strided_slice %93 {offsets = [0, 0], sizes = [32, 16], strides = [1, 1]} : vector<32x256xf32> to vector<32x16xf32>
    %146 = tpu.concatenate %144, %145 in 1 : vector<32x240xf32>, vector<32x16xf32> -> vector<32x256xf32>
    %c7_65 = arith.constant 7 : index
    %c0_66 = arith.constant 0 : index
    %147 = vector.load %arg9[%c7_65, %c0_66] : memref<9x256xf32, #tpu.memory_space<vmem>>, vector<1x256xf32>
    %148 = vector.broadcast %147 : vector<1x256xf32> to vector<32x256xf32>
    %149 = arith.mulf %146, %148 : vector<32x256xf32>
    %150 = arith.truncf %149 : vector<32x256xf32> to vector<32x256xbf16>
    %c224_67 = arith.constant 224 : index
    %c0_68 = arith.constant 0 : index
    %151 = vector.load %arg11[%c224_67, %c0_68] : memref<288x256xbf16, #tpu.memory_space<vmem>>, vector<32x256xbf16>
    tpu.vector_store %arg11[%c224_67, %c0_68], %150 {strides = array<i32>} : memref<288x256xbf16, #tpu.memory_space<vmem>>, vector<32x256xbf16>,
    %152 = vector.extract_strided_slice %93 {offsets = [0, 17], sizes = [32, 239], strides = [1, 1]} : vector<32x256xf32> to vector<32x239xf32>
    %153 = vector.extract_strided_slice %93 {offsets = [0, 0], sizes = [32, 17], strides = [1, 1]} : vector<32x256xf32> to vector<32x17xf32>
    %154 = tpu.concatenate %152, %153 in 1 : vector<32x239xf32>, vector<32x17xf32> -> vector<32x256xf32>
    %c8_69 = arith.constant 8 : index
    %c0_70 = arith.constant 0 : index
    %155 = vector.load %arg9[%c8_69, %c0_70] : memref<9x256xf32, #tpu.memory_space<vmem>>, vector<1x256xf32>
    %156 = vector.broadcast %155 : vector<1x256xf32> to vector<32x256xf32>
    %157 = arith.mulf %154, %156 : vector<32x256xf32>
    %158 = arith.truncf %157 : vector<32x256xf32> to vector<32x256xbf16>
    %c256_71 = arith.constant 256 : index
    %c0_72 = arith.constant 0 : index
    %159 = vector.load %arg11[%c256_71, %c0_72] : memref<288x256xbf16, #tpu.memory_space<vmem>>, vector<32x256xbf16>
    tpu.vector_store %arg11[%c256_71, %c0_72], %158 {strides = array<i32>} : memref<288x256xbf16, #tpu.memory_space<vmem>>, vector<32x256xbf16>,
    %c0_73 = arith.constant 0 : index
    %c0_74 = arith.constant 0 : index
    %160 = vector.load %arg5[%c0_73, %c0_74] : memref<32x288xbf16, #tpu.memory_space<vmem>>, vector<32x288xbf16>
    %c0_75 = arith.constant 0 : index
    %c0_76 = arith.constant 0 : index
    %161 = vector.load %arg11[%c0_75, %c0_76] : memref<288x256xbf16, #tpu.memory_space<vmem>>, vector<288x256xbf16>
    %cst_77 = arith.constant dense<0.000000e+00> : vector<32x256xf32>
    %162 = tpu.matmul %160, %161, %cst_77 {dimension_numbers = #tpu.dot_dimension_numbers<[1], [0], [0], [1], [0, 0, 1, 1], [], []>} : vector<32x288xbf16>, vector<288x256xbf16>, vector<32x256xf32> -> vector<32x256xf32>
    %cst_78 = arith.constant dense<0.000000e+00> : vector<32xf32>
    %163 = vector.multi_reduction <add>, %162, %cst_78 [1] : vector<32x256xf32> to vector<32xf32>
    %164 = vector.shape_cast %163 : vector<32xf32> to vector<32x1xf32>
    %c0_79 = arith.constant 0 : index
    %c0_80 = arith.constant 0 : index
    %165 = vector.load %arg8[%c0_79, %c0_80] : memref<32x32xf32, #tpu.memory_space<vmem>>, vector<32x32xf32>
    %cst_81 = arith.constant dense<0.000000e+00> : vector<32x1xf32>
    %166 = tpu.matmul %165, %164, %cst_81 {dimension_numbers = #tpu.dot_dimension_numbers<[1], [0], [0], [1], [0, 0, 1, 1], [], []>} : vector<32x32xf32>, vector<32x1xf32>, vector<32x1xf32> -> vector<32x1xf32>
    %167 = vector.broadcast %166 : vector<32x1xf32> to vector<32x256xf32>
    %168 = arith.subf %162, %167 : vector<32x256xf32>
    %c0_82 = arith.constant 0 : index
    %c0_83 = arith.constant 0 : index
    %169 = vector.load %arg8[%c0_82, %c0_83] : memref<32x32xf32, #tpu.memory_space<vmem>>, vector<32x32xf32>
    %170 = arith.mulf %168, %168 : vector<32x256xf32>
    %cst_84 = arith.constant dense<0.000000e+00> : vector<32xf32>
    %171 = vector.multi_reduction <add>, %170, %cst_84 [1] : vector<32x256xf32> to vector<32xf32>
    %172 = vector.shape_cast %171 : vector<32xf32> to vector<32x1xf32>
    %cst_85 = arith.constant dense<0.000000e+00> : vector<32x1xf32>
    %173 = tpu.matmul %169, %172, %cst_85 {dimension_numbers = #tpu.dot_dimension_numbers<[1], [0], [0], [1], [0, 0, 1, 1], [], []>} : vector<32x32xf32>, vector<32x1xf32>, vector<32x1xf32> -> vector<32x1xf32>
    %cst_86 = arith.constant 9.99999974E-6 : f32
    %174 = vector.broadcast %cst_86 : f32 to vector<32x1xf32>
    %175 = arith.addf %173, %174 : vector<32x1xf32>
    %176 = math.rsqrt %175 : vector<32x1xf32>
    %c0_87 = arith.constant 0 : index
    %c0_88 = arith.constant 0 : index
    %177 = vector.load %arg6[%c0_87, %c0_88] : memref<32x1xf32, #tpu.memory_space<vmem>>, vector<32x1xf32>
    %178 = arith.mulf %176, %177 : vector<32x1xf32>
    %179 = vector.broadcast %178 : vector<32x1xf32> to vector<32x256xf32>
    %180 = arith.mulf %168, %179 : vector<32x256xf32>
    %c0_89 = arith.constant 0 : index
    %c0_90 = arith.constant 0 : index
    %181 = vector.load %arg7[%c0_89, %c0_90] : memref<32x1xf32, #tpu.memory_space<vmem>>, vector<32x1xf32>
    %182 = vector.broadcast %181 : vector<32x1xf32> to vector<32x256xf32>
    %183 = arith.addf %180, %182 : vector<32x256xf32>
    %184 = arith.addf %183, %1 : vector<32x256xf32>
    %cst_91 = arith.constant 0.000000e+00 : f32
    %185 = vector.broadcast %cst_91 : f32 to vector<32x256xf32>
    %186 = arith.maximumf %184, %185 : vector<32x256xf32>
    %c0_92 = arith.constant 0 : index
    %c0_93 = arith.constant 0 : index
    %c0_94 = arith.constant 0 : index
    %187 = vector.load %arg10[%c0_92, %c0_93, %c0_94] : memref<1x32x256xf32, #tpu.memory_space<vmem>>, vector<1x32x256xf32>
    %188 = vector.shape_cast %187 : vector<1x32x256xf32> to vector<32x256xf32>
    %189 = vector.shape_cast %186 : vector<32x256xf32> to vector<1x32x256xf32>
    tpu.vector_store %arg10[%c0_92, %c0_93, %c0_94], %189 {strides = array<i32>} : memref<1x32x256xf32, #tpu.memory_space<vmem>>, vector<1x32x256xf32>,
    return
  }
  func.func @transform_0(%arg0: i32) -> (i32, i32, i32) {
    %c0_i32 = arith.constant 0 : i32
    %c0_i32_0 = arith.constant 0 : i32
    %c0_i32_1 = arith.constant 0 : i32
    return %arg0, %c0_i32, %c0_i32_0 : i32, i32, i32
  }
  func.func @transform_1(%arg0: i32) -> (i32, i32) {
    %c0_i32 = arith.constant 0 : i32
    %c0_i32_0 = arith.constant 0 : i32
    %c0_i32_1 = arith.constant 0 : i32
    return %c0_i32, %c0_i32_0 : i32, i32
  }
  func.func @transform_2(%arg0: i32) -> (i32, i32) {
    %c0_i32 = arith.constant 0 : i32
    %c0_i32_0 = arith.constant 0 : i32
    %c0_i32_1 = arith.constant 0 : i32
    return %c0_i32, %c0_i32_0 : i32, i32
  }
  func.func @transform_3(%arg0: i32) -> (i32, i32) {
    %c0_i32 = arith.constant 0 : i32
    %c0_i32_0 = arith.constant 0 : i32
    %c0_i32_1 = arith.constant 0 : i32
    return %c0_i32, %c0_i32_0 : i32, i32
  }
  func.func @transform_4(%arg0: i32) -> (i32, i32) {
    %c0_i32 = arith.constant 0 : i32
    %c0_i32_0 = arith.constant 0 : i32
    %c0_i32_1 = arith.constant 0 : i32
    return %c0_i32, %c0_i32_0 : i32, i32
  }
  func.func @transform_5(%arg0: i32) -> (i32, i32) {
    %c0_i32 = arith.constant 0 : i32
    %c0_i32_0 = arith.constant 0 : i32
    %c0_i32_1 = arith.constant 0 : i32
    return %c0_i32, %c0_i32_0 : i32, i32
  }
  func.func @transform_6(%arg0: i32) -> (i32, i32) {
    %c0_i32 = arith.constant 0 : i32
    %c0_i32_0 = arith.constant 0 : i32
    %c0_i32_1 = arith.constant 0 : i32
    return %c0_i32, %c0_i32_0 : i32, i32
  }
  func.func @transform_7(%arg0: i32) -> (i32, i32) {
    %c0_i32 = arith.constant 0 : i32
    %c0_i32_0 = arith.constant 0 : i32
    %c0_i32_1 = arith.constant 0 : i32
    return %c0_i32, %c0_i32_0 : i32, i32
  }
  func.func @transform_8(%arg0: i32) -> (i32, i32) {
    %c0_i32 = arith.constant 0 : i32
    %c0_i32_0 = arith.constant 0 : i32
    %c0_i32_1 = arith.constant 0 : i32
    return %c0_i32, %c0_i32_0 : i32, i32
  }
  func.func @transform_9(%arg0: i32) -> (i32, i32, i32) {
    %c0_i32 = arith.constant 0 : i32
    %c0_i32_0 = arith.constant 0 : i32
    %c0_i32_1 = arith.constant 0 : i32
    return %arg0, %c0_i32, %c0_i32_0 : i32, i32, i32
  }
}

</mosaic_0001>

<bundles_post_ra>
// kernel: basic_block_forward.1
= control target key start
LH: loop header
LB: loop body
LE: loop exit
PB: predicated region body
PF: predicated region fallthrough
CT: control target
= control target key end

     0   :  { %s2830_s30 = smov 0   ;;  %s3664_s0 = inlined_call_operand.vmem [shape: f32[2,32,256], index: 0, kind: input, shape index: {}]   ;;  %s3665_s1 = inlined_call_operand.vmem [shape: bf16[32,288], index: 1, kind: input, shape index: {}]   ;;  %s3666_s2 = inlined_call_operand.vmem [shape: f32[32,1], index: 2, kind: input, shape index: {}]   ;;  %s3667_s3 = inlined_call_operand.vmem [shape: f32[32,1], index: 3, kind: input, shape index: {}]   ;;  %s3668_s4 = inlined_call_operand.vmem [shape: bf16[32,288], index: 4, kind: input, shape index: {}]   ;;  %s3669_s5 = inlined_call_operand.vmem [shape: f32[32,1], index: 5, kind: input, shape index: {}]   ;;  %s3670_s6 = inlined_call_operand.vmem [shape: f32[32,1], index: 6, kind: input, shape index: {}]   ;;  %s3671_s7 = inlined_call_operand.vmem [shape: f32[32,32], index: 7, kind: input, shape index: {}]   ;;  %s3672_s8 = inlined_call_operand.vmem [shape: f32[9,256], index: 8, kind: input, shape index: {}]   ;;  %s3673_s9 = inlined_call_operand.vmem [shape: f32[2,32,256], index: 9, kind: output, shape index: {}]  }
   0x1 LB: > { %s2509_s10 = sadd.s32 4294967295, %s2769_s30   ;;  %p2513_p0 = scmp.ge.s32.totalorder %s2769_s30, 1  ;;  %s2769_s30 = sphi %s2830_s30, %s19_s30  }
   0x2   : > { %p287_p1 = scmp.lt.s32.totalorder %s2769_s30, 3 }
   0x4   : > { %p288_p2 = pnand %p2513_p0, %p287_p1 }
   0x5   : > { %p323_p3 = scmp.lt.s32.totalorder (!%p288_p2), %s2509_s10, 1  ;;  %s2771_s15 = smov (!%p288_p2), 17   ;;  %v2725_v8 = vld [vmem:[%s3665_s1 + $0x4] ss:$12 sps:$4 sm:$0xff] (!%p288_p2)   ;;  %v389_v9 = vlaneseq (!%p288_p2)  ;;  %vm370_vm0 = vcmask (!%p288_p2), 138240   ;;  %v2779_v22 = vmov (!%p288_p2), 0  }
   0x6   : > { %291 = sbr.rel (%p288_p2) target bundleno = 3005 (0xbbd), region = 56  ;;  %s2772_s16 = smov (!%p288_p2), 16   ;;  %998 = vmatprep.mubr.bf16.mxu0 (!%p288_p2), %v2725_v8  ;;  %v387_v12 = vld [vmem:[%s3672_s8] ss:$8 sm:$0x3] (!%p288_p2)  ;;  %2721 = vset.pattern.permute.xlu0 (!%p288_p2), %v2779_v22  ;;  %vm435_vm1 = vcmask (!%p288_p2), 130048  }
   0x7   : > { %s2773_s17 = smov (!%p288_p2), 15   ;;  %s2774_s18 = smov (!%p288_p2), 1   ;;  %v390_v10 = vshrl.u32 (!%p288_p2), %v389_v9, 7  ;;  %2722 = vset.pattern.permute.xlu1 (!%p288_p2), %v2779_v22  ;;  %v2518_v43 = vld [vmem:[%s3672_s8 + $0x1] ss:$8 sm:$0x3] (!%p288_p2) }
   0x8   : > { %s2775_s19 = smov (!%p288_p2), 127   ;;  %s2776_s20 = smov (!%p288_p2), 113   ;;  %vm501_vm2 = vcmask (!%p288_p2), 121856   ;;  %vm567_vm3 = vcmask (!%p288_p2), 7168   ;;  %vm637_vm4 = vcmask (!%p288_p2), 1039360   ;;  %vm703_vm5 = vcmask (!%p288_p2), 924672  }
   0x9   : > { %s2777_s21 = smov (!%p288_p2), 112   ;;  %v2987_v11 = vsub.s32 (!%p288_p2), 1, %v390_v10  ;;  %s2778_s24 = smov (!%p288_p2), 111   ;;  %v2996_v13 = vsub.s32 (!%p288_p2), 0, %v390_v10  ;;  %vm769_vm6 = vcmask (!%p288_p2), 916480   ;;  %vm835_vm7 = vcmask (!%p288_p2), 908288  }
   0xa   : > { %vm959_vm8 = vcmask (!%p288_p2), 261120  }
   0xb   : > { %v396_v16 = vrot.slane (!%p288_p2), %v387_v12, %v2987_v11  ;;  %v392_v18 = vrot.slane (!%p288_p2), %v387_v12, %v2996_v13  ;;  %v458_v48 = vrot.slane (!%p288_p2), %v2518_v43, %v2996_v13  ;;  %v462_v49 = vrot.slane (!%p288_p2), %v2518_v43, %v2987_v11 }
   0xd   : > { %s3675_s10 = smov (!%p323_p3, %s2509_s10), 1 }
   0xe   : > { %s2566_s11 = sshll.u32 %s3675_s10, 6 }
   0xf   : > { %s2846_s14 = scalar_lea.vmem %s3664_s0, %s2566_s11 }
  0x10   : > { %v2849_v0 = vld [vmem:[%s2846_s14 + $0x8] sm:$0xff]  ;;  %v2852_v1 = vld [vmem:[%s2846_s14] sm:$0xff]  ;;  %v2859_v2 = vld [vmem:[%s2846_s14 + $0x18] sm:$0xff] }
  0x11   : > { %346 = vrot.lane.b32.xlu0 %v2849_v0, %s2771_s15  ;;  %362 = vrot.lane.b32.xlu1 %v2852_v1, %s2771_s15  ;;  %v2862_v3 = vld [vmem:[%s2846_s14 + $0x10] sm:$0xff]  ;;  %v2869_v4 = vld [vmem:[%s2846_s14 + $0x28] sm:$0xff] }
  0x12   : > { %v2872_v5 = vld [vmem:[%s2846_s14 + $0x38] sm:$0xff]  ;;  %v2879_v6 = vld [vmem:[%s2846_s14 + $0x20] sm:$0xff]  ;;  %v2882_v7 = vld [vmem:[%s2846_s14 + $0x30] sm:$0xff] }
  0x15   : > { %348 = vrot.lane.b32.xlu0 %v2859_v2, %s2771_s15  ;;  %364 = vrot.lane.b32.xlu1 %v2862_v3, %s2771_s15 }
  0x19   : > { %350 = vrot.lane.b32.xlu0 %v2869_v4, %s2771_s15  ;;  %352 = vrot.lane.b32.xlu1 %v2872_v5, %s2771_s15 }
  0x1d   : > { %366 = vrot.lane.b32.xlu0 %v2879_v6, %s2771_s15  ;;  %368 = vrot.lane.b32.xlu1 %v2882_v7, %s2771_s15 }
  0x21   : > { %415 = vrot.lane.b32.xlu0 %v2849_v0, %s2772_s16  ;;  %417 = vrot.lane.b32.xlu1 %v2859_v2, %s2772_s16 }
  0x25   : > { %427 = vrot.lane.b32.xlu0 %v2852_v1, %s2772_s16  ;;  %429 = vrot.lane.b32.xlu1 %v2862_v3, %s2772_s16 }
  0x29   : > { %419 = vrot.lane.b32.xlu0 %v2869_v4, %s2772_s16  ;;  %421 = vrot.lane.b32.xlu1 %v2872_v5, %s2772_s16 }
  0x2d   : > { %431 = vrot.lane.b32.xlu0 %v2879_v6, %s2772_s16  ;;  %433 = vrot.lane.b32.xlu1 %v2882_v7, %s2772_s16 }
  0x31   : > { %481 = vrot.lane.b32.xlu0 %v2849_v0, %s2773_s17  ;;  %483 = vrot.lane.b32.xlu1 %v2859_v2, %s2773_s17 }
  0x35   : > { %493 = vrot.lane.b32.xlu0 %v2852_v1, %s2773_s17  ;;  %495 = vrot.lane.b32.xlu1 %v2862_v3, %s2773_s17 }
  0x39   : > { %485 = vrot.lane.b32.xlu0 %v2869_v4, %s2773_s17  ;;  %487 = vrot.lane.b32.xlu1 %v2872_v5, %s2773_s17 }
  0x3d   : > { %497 = vrot.lane.b32.xlu0 %v2879_v6, %s2773_s17  ;;  %499 = vrot.lane.b32.xlu1 %v2882_v7, %s2773_s17 }
  0x41   : > { %547 = vrot.lane.b32.xlu0 %v2849_v0, %s2774_s18  ;;  %549 = vrot.lane.b32.xlu1 %v2859_v2, %s2774_s18 }
  0x45   : > { %559 = vrot.lane.b32.xlu0 %v2852_v1, %s2774_s18  ;;  %561 = vrot.lane.b32.xlu1 %v2862_v3, %s2774_s18 }
  0x49   : > { %551 = vrot.lane.b32.xlu0 %v2869_v4, %s2774_s18  ;;  %553 = vrot.lane.b32.xlu1 %v2872_v5, %s2774_s18 }
  0x4d   : > { %563 = vrot.lane.b32.xlu0 %v2879_v6, %s2774_s18  ;;  %565 = vrot.lane.b32.xlu1 %v2882_v7, %s2774_s18 }
  0x51   : > { %621 = vrot.lane.b32.xlu0 %v2852_v1, %s2775_s19  ;;  %623 = vrot.lane.b32.xlu1 %v2849_v0, %s2775_s19 }
  0x55   : > { %625 = vrot.lane.b32.xlu0 %v2862_v3, %s2775_s19  ;;  %627 = vrot.lane.b32.xlu1 %v2859_v2, %s2775_s19 }
  0x59   : > { %629 = vrot.lane.b32.xlu0 %v2879_v6, %s2775_s19  ;;  %631 = vrot.lane.b32.xlu1 %v2869_v4, %s2775_s19 }
  0x5d   : > { %633 = vrot.lane.b32.xlu0 %v2882_v7, %s2775_s19  ;;  %635 = vrot.lane.b32.xlu1 %v2872_v5, %s2775_s19 }
  0x61   : > { %687 = vrot.lane.b32.xlu0 %v2852_v1, %s2776_s20  ;;  %689 = vrot.lane.b32.xlu1 %v2849_v0, %s2776_s20 }
  0x65   : > { %691 = vrot.lane.b32.xlu0 %v2862_v3, %s2776_s20  ;;  %693 = vrot.lane.b32.xlu1 %v2859_v2, %s2776_s20 }
  0x69   : > { %695 = vrot.lane.b32.xlu0 %v2879_v6, %s2776_s20  ;;  %697 = vrot.lane.b32.xlu1 %v2869_v4, %s2776_s20 }
  0x6d   : > { %699 = vrot.lane.b32.xlu0 %v2882_v7, %s2776_s20  ;;  %701 = vrot.lane.b32.xlu1 %v2872_v5, %s2776_s20 }
  0x71   : > { %753 = vrot.lane.b32.xlu0 %v2852_v1, %s2777_s21  ;;  %755 = vrot.lane.b32.xlu1 %v2849_v0, %s2777_s21 }
  0x75   : > { %757 = vrot.lane.b32.xlu0 %v2862_v3, %s2777_s21  ;;  %759 = vrot.lane.b32.xlu1 %v2859_v2, %s2777_s21 }
  0x79   : > { %761 = vrot.lane.b32.xlu0 %v2879_v6, %s2777_s21  ;;  %763 = vrot.lane.b32.xlu1 %v2869_v4, %s2777_s21 }
  0x7d   : > { %765 = vrot.lane.b32.xlu0 %v2882_v7, %s2777_s21  ;;  %767 = vrot.lane.b32.xlu1 %v2872_v5, %s2777_s21 }
  0x81   : > { %819 = vrot.lane.b32.xlu0 %v2852_v1, %s2778_s24  ;;  %821 = vrot.lane.b32.xlu1 %v2849_v0, %s2778_s24 }
  0x83   : > { %v347_v14 = vpop.permute.xlu0 %346  ;;  %v363_v15 = vpop.permute.xlu1 %362 }
  0x84   : > { %v371_v17 = vsel %vm370_vm0, %v363_v15, %v347_v14  ;;  %v383_v19 = vsel %vm370_vm0, %v347_v14, %v363_v15 }
  0x85   : > { %823 = vrot.lane.b32.xlu0 %v2862_v3, %s2778_s24  ;;  %825 = vrot.lane.b32.xlu1 %v2859_v2, %s2778_s24  ;;  %v400_v25 = vmul.f32 %v396_v16, %v371_v17  ;;  %v399_v27 = vmul.f32 %v392_v18, %v383_v19 }
  0x87   : > { %v349_v20 = vpop.permute.xlu0 %348  ;;  %v365_v21 = vpop.permute.xlu1 %364 }
  0x88   : > { %v384_v23 = vsel %vm370_vm0, %v349_v20, %v365_v21  ;;  %v372_v24 = vsel %vm370_vm0, %v365_v21, %v349_v20  ;;  %v2519_v20 = vld [vmem:[%s3672_s8 + $0x2] ss:$8 sm:$0x3] }
  0x89   : > { %827 = vrot.lane.b32.xlu0 %v2879_v6, %s2778_s24  ;;  %829 = vrot.lane.b32.xlu1 %v2869_v4, %s2778_s24  ;;  %v402_v26 = vmul.f32 %v396_v16, %v372_v24  ;;  %v401_v28 = vmul.f32 %v392_v18, %v384_v23 }
  0x8b   : > { %v351_v29 = vpop.permute.xlu0 %350  ;;  %v353_v30 = vpop.permute.xlu1 %352  ;;  %v408_v31 = vpack.c.bf16 %v402_v26, %v400_v25  ;;  %v407_v32 = vpack.c.bf16 %v401_v28, %v399_v27  ;;  %v524_v26 = vrot.slane %v2519_v20, %v2996_v13  ;;  %v528_v27 = vrot.slane %v2519_v20, %v2987_v11 }
  0x8d   : > { %831 = vrot.lane.b32.xlu0 %v2882_v7, %s2778_s24  ;;  %833 = vrot.lane.b32.xlu1 %v2872_v5, %s2778_s24 }
  0x8e   : > { %966 = vmatprep.subr.bf16.mxu0 %v408_v31 }
  0x8f   : > { %967 = vmatpush1.bf16.msra.mxu0 %v407_v32  ;;  %v367_v33 = vpop.permute.xlu0 %366  ;;  %v369_v34 = vpop.permute.xlu1 %368 }
  0x90   : > { %v373_v35 = vsel %vm370_vm0, %v367_v33, %v351_v29  ;;  %v385_v36 = vsel %vm370_vm0, %v351_v29, %v367_v33  ;;  %v374_v37 = vsel %vm370_vm0, %v369_v34, %v353_v30  ;;  %v386_v38 = vsel %vm370_vm0, %v353_v30, %v369_v34 }
  0x91   : > { %v403_v39 = vmul.f32 %v392_v18, %v385_v36  ;;  %v404_v40 = vmul.f32 %v396_v16, %v373_v35  ;;  %v405_v41 = vmul.f32 %v392_v18, %v386_v38  ;;  %v406_v42 = vmul.f32 %v396_v16, %v374_v37 }
  0x93   : > { %v416_v44 = vpop.permute.xlu0 %415  ;;  %v418_v45 = vpop.permute.xlu1 %417  ;;  %v410_v46 = vpack.c.bf16 %v406_v42, %v404_v40  ;;  %v409_v47 = vpack.c.bf16 %v405_v41, %v403_v39 }
  0x95   : > { %968 = vmatprep.subr.bf16.mxu0 %v410_v46 }
  0x96   : > { %969 = vmatpush1.bf16.msra.mxu0 %v409_v47 }
  0x97   : > { %v428_v50 = vpop.permute.xlu0 %427  ;;  %v430_v51 = vpop.permute.xlu1 %429 }
  0x98   : > { %v436_v52 = vsel %vm435_vm1, %v428_v50, %v416_v44  ;;  %v448_v53 = vsel %vm435_vm1, %v416_v44, %v428_v50  ;;  %v437_v54 = vsel %vm435_vm1, %v430_v51, %v418_v45  ;;  %v449_v55 = vsel %vm435_vm1, %v418_v45, %v430_v51 }
  0x99   : > { %v465_v56 = vmul.f32 %v458_v48, %v448_v53  ;;  %v466_v57 = vmul.f32 %v462_v49, %v436_v52  ;;  %v467_v58 = vmul.f32 %v458_v48, %v449_v55  ;;  %v468_v59 = vmul.f32 %v462_v49, %v437_v54  ;;  %v2520_v52 = vld [vmem:[%s3672_s8 + $0x3] ss:$8 sm:$0x3] }
  0x9b   : > { %v420_v60 = vpop.permute.xlu0 %419  ;;  %v422_v61 = vpop.permute.xlu1 %421  ;;  %v474_v62 = vpack.c.bf16 %v468_v59, %v466_v57  ;;  %v473_v63 = vpack.c.bf16 %v467_v58, %v465_v56  ;;  %v590_v57 = vrot.slane %v2520_v52, %v2996_v13  ;;  %v594_v58 = vrot.slane %v2520_v52, %v2987_v11 }
  0x9d   : > { %970 = vmatprep.subr.bf16.mxu0 %v474_v62 }
  0x9e   : > { %971 = vmatpush1.bf16.msra.mxu0 %v473_v63 }
  0x9f   : > { %v432_v8 = vpop.permute.xlu0 %431  ;;  %v434_v9 = vpop.permute.xlu1 %433 }
  0xa0   : > { %v438_v10 = vsel %vm435_vm1, %v432_v8, %v420_v60  ;;  %v450_v12 = vsel %vm435_vm1, %v420_v60, %v432_v8  ;;  %v439_v14 = vsel %vm435_vm1, %v434_v9, %v422_v61  ;;  %v451_v15 = vsel %vm435_vm1, %v422_v61, %v434_v9 }
  0xa1   : > { %v469_v16 = vmul.f32 %v458_v48, %v450_v12  ;;  %v470_v17 = vmul.f32 %v462_v49, %v438_v10  ;;  %v471_v18 = vmul.f32 %v458_v48, %v451_v15  ;;  %v472_v19 = vmul.f32 %v462_v49, %v439_v14 }
  0xa3   : > { %v482_v21 = vpop.permute.xlu0 %481  ;;  %v484_v23 = vpop.permute.xlu1 %483  ;;  %v476_v24 = vpack.c.bf16 %v472_v19, %v470_v17  ;;  %v475_v25 = vpack.c.bf16 %v471_v18, %v469_v16 }
  0xa5   : > { %972 = vmatprep.subr.bf16.mxu0 %v476_v24 }
  0xa6   : > { %973 = vmatpush1.bf16.msra.mxu0 %v475_v25 }
  0xa7   : > { %v494_v28 = vpop.permute.xlu0 %493  ;;  %v496_v29 = vpop.permute.xlu1 %495 }
  0xa8   : > { %v502_v30 = vsel %vm501_vm2, %v494_v28, %v482_v21  ;;  %v514_v31 = vsel %vm501_vm2, %v482_v21, %v494_v28  ;;  %v503_v32 = vsel %vm501_vm2, %v496_v29, %v484_v23  ;;  %v515_v33 = vsel %vm501_vm2, %v484_v23, %v496_v29 }
  0xa9   : > { %v531_v34 = vmul.f32 %v524_v26, %v514_v31  ;;  %v532_v35 = vmul.f32 %v528_v27, %v502_v30  ;;  %v533_v36 = vmul.f32 %v524_v26, %v515_v33  ;;  %v534_v37 = vmul.f32 %v528_v27, %v503_v32 }
  0xab   : > { %v486_v38 = vpop.permute.xlu0 %485  ;;  %v488_v39 = vpop.permute.xlu1 %487  ;;  %v540_v40 = vpack.c.bf16 %v534_v37, %v532_v35  ;;  %v539_v41 = vpack.c.bf16 %v533_v36, %v531_v34  ;;  %v614_v34 = vpack.c.bf16 %v2859_v2, %v2849_v0  ;;  %v2521_v35 = vld [vmem:[%s3672_s8 + $0x5] ss:$8 sm:$0x3]  ;;  %v613_v36 = vpack.c.bf16 %v2862_v3, %v2852_v1 }
  0xac   : > { %v668_v37 = vrot.slane %v2521_v35, %v2987_v11  ;;  %v615_v1 = vpack.c.bf16 %v2882_v7, %v2879_v6 }
  0xad   : > { %974 = vmatprep.subr.bf16.mxu0 %v540_v40  ;;  %v616_v40 = vpack.c.bf16 %v2872_v5, %v2869_v4 }
  0xae   : > { %975 = vmatpush1.bf16.msra.mxu0 %v539_v41 }
  0xaf   : > { %v498_v42 = vpop.permute.xlu0 %497  ;;  %v500_v43 = vpop.permute.xlu1 %499 }
  0xb0   : > { %v504_v44 = vsel %vm501_vm2, %v498_v42, %v486_v38  ;;  %v516_v45 = vsel %vm501_vm2, %v486_v38, %v498_v42  ;;  %v505_v46 = vsel %vm501_vm2, %v500_v43, %v488_v39  ;;  %v517_v47 = vsel %vm501_vm2, %v488_v39, %v500_v43 }
  0xb1   : > { %v535_v48 = vmul.f32 %v524_v26, %v516_v45  ;;  %v536_v49 = vmul.f32 %v528_v27, %v504_v44  ;;  %v537_v50 = vmul.f32 %v524_v26, %v517_v47  ;;  %v538_v51 = vmul.f32 %v528_v27, %v505_v46 }
  0xb2   : > { %v664_v43 = vrot.slane %v2521_v35, %v2996_v13  ;;  %v2523_v35 = vld [vmem:[%s3672_s8 + $0x7] ss:$8 sm:$0x3] }
  0xb3   : > { %v548_v53 = vpop.permute.xlu0 %547  ;;  %v550_v54 = vpop.permute.xlu1 %549  ;;  %v542_v55 = vpack.c.bf16 %v538_v51, %v536_v49  ;;  %v541_v56 = vpack.c.bf16 %v537_v50, %v535_v48 }
  0xb5   : > { %976 = vmatprep.subr.bf16.mxu0 %v542_v55 }
  0xb6   : > { %977 = vmatpush1.bf16.msra.mxu0 %v541_v56 }
  0xb7   : > { %v560_v59 = vpop.permute.xlu0 %559  ;;  %v562_v60 = vpop.permute.xlu1 %561 }
  0xb8   : > { %v568_v61 = vsel %vm567_vm3, %v560_v59, %v548_v53  ;;  %v580_v62 = vsel %vm567_vm3, %v548_v53, %v560_v59  ;;  %v569_v63 = vsel %vm567_vm3, %v562_v60, %v550_v54  ;;  %v581_v8 = vsel %vm567_vm3, %v550_v54, %v562_v60 }
  0xb9   : > { %v597_v9 = vmul.f32 %v590_v57, %v580_v62  ;;  %v598_v10 = vmul.f32 %v594_v58, %v568_v61  ;;  %v599_v12 = vmul.f32 %v590_v57, %v581_v8  ;;  %v600_v14 = vmul.f32 %v594_v58, %v569_v63 }
  0xbb   : > { %v552_v15 = vpop.permute.xlu0 %551  ;;  %v554_v16 = vpop.permute.xlu1 %553  ;;  %v606_v17 = vpack.c.bf16 %v600_v14, %v598_v10  ;;  %v605_v18 = vpack.c.bf16 %v599_v12, %v597_v9 }
  0xbd   : > { %978 = vmatprep.subr.bf16.mxu0 %v606_v17 }
  0xbe   : > { %979 = vmatpush1.bf16.msra.mxu0 %v605_v18 }
  0xbf   : > { %v564_v19 = vpop.permute.xlu0 %563  ;;  %v566_v20 = vpop.permute.xlu1 %565 }
  0xc0   : > { %v570_v21 = vsel %vm567_vm3, %v564_v19, %v552_v15  ;;  %v582_v23 = vsel %vm567_vm3, %v552_v15, %v564_v19  ;;  %v571_v24 = vsel %vm567_vm3, %v566_v20, %v554_v16  ;;  %v583_v25 = vsel %vm567_vm3, %v554_v16, %v566_v20 }
  0xc1   : > { %v601_v26 = vmul.f32 %v590_v57, %v582_v23  ;;  %v602_v27 = vmul.f32 %v594_v58, %v570_v21  ;;  %v603_v28 = vmul.f32 %v590_v57, %v583_v25  ;;  %v604_v29 = vmul.f32 %v594_v58, %v571_v24  ;;  %v2522_v57 = vld [vmem:[%s3672_s8 + $0x6] ss:$8 sm:$0x3] }
  0xc2   : > { %v730_v62 = vrot.slane %v2522_v57, %v2996_v13  ;;  %v734_v63 = vrot.slane %v2522_v57, %v2987_v11 }
  0xc3   : > { %v622_v30 = vpop.permute.xlu0 %621  ;;  %v624_v31 = vpop.permute.xlu1 %623  ;;  %v608_v32 = vpack.c.bf16 %v604_v29, %v602_v27  ;;  %v607_v33 = vpack.c.bf16 %v603_v28, %v601_v26 }
  0xc4   : > { %v654_v0 = vsel %vm637_vm4, %v624_v31, %v622_v30  ;;  %v638_v3 = vsel %vm637_vm4, %v622_v30, %v624_v31 }
  0xc5   : > { %980 = vmatprep.subr.bf16.mxu0 %v608_v32  ;;  %v672_v44 = vmul.f32 %v668_v37, %v654_v0  ;;  %v671_v47 = vmul.f32 %v664_v43, %v638_v3  ;;  %v800_v0 = vrot.slane %v2523_v35, %v2987_v11 }
  0xc6   : > { %981 = vmatpush1.bf16.msra.mxu0 %v607_v33 }
  0xc7   : > { %v626_v38 = vpop.permute.xlu0 %625  ;;  %v628_v39 = vpop.permute.xlu1 %627  ;;  %982 = vmatprep.subr.bf16.mxu0 %v614_v34 }
  0xc8   : > { %v655_v2 = vsel %vm637_vm4, %v628_v39, %v626_v38  ;;  %v639_v41 = vsel %vm637_vm4, %v626_v38, %v628_v39 }
  0xc9   : > { %v674_v42 = vmul.f32 %v668_v37, %v655_v2  ;;  %v673_v4 = vmul.f32 %v664_v43, %v639_v41 }
  0xca   : > { %983 = vmatpush1.bf16.msra.mxu0 %v613_v36 }
  0xcb   : > { %v630_v45 = vpop.permute.xlu0 %629  ;;  %v632_v46 = vpop.permute.xlu1 %631  ;;  %984 = vmatprep.subr.bf16.mxu0 %v616_v40  ;;  %v680_v5 = vpack.c.bf16 %v674_v42, %v672_v44  ;;  %v679_v7 = vpack.c.bf16 %v673_v4, %v671_v47  ;;  %v796_v40 = vrot.slane %v2523_v35, %v2996_v13 }
  0xcc   : > { %v640_v48 = vsel %vm637_vm4, %v630_v45, %v632_v46  ;;  %v656_v49 = vsel %vm637_vm4, %v632_v46, %v630_v45 }
  0xcd   : > { %v675_v53 = vmul.f32 %v664_v43, %v640_v48  ;;  %v676_v54 = vmul.f32 %v668_v37, %v656_v49 }
  0xce   : > { %985 = vmatpush1.bf16.msra.mxu0 %v615_v1 }
  0xcf   : > { %v634_v50 = vpop.permute.xlu0 %633  ;;  %v636_v51 = vpop.permute.xlu1 %635  ;;  %986 = vmatprep.subr.bf16.mxu0 %v680_v5 }
  0xd0   : > { %v641_v52 = vsel %vm637_vm4, %v634_v50, %v636_v51  ;;  %v657_v6 = vsel %vm637_vm4, %v636_v51, %v634_v50 }
  0xd1   : > { %v677_v55 = vmul.f32 %v664_v43, %v641_v52  ;;  %v678_v56 = vmul.f32 %v668_v37, %v657_v6 }
  0xd2   : > { %987 = vmatpush1.bf16.msra.mxu0 %v679_v7 }
  0xd3   : > { %v688_v58 = vpop.permute.xlu0 %687  ;;  %v690_v59 = vpop.permute.xlu1 %689  ;;  %v682_v60 = vpack.c.bf16 %v678_v56, %v676_v54  ;;  %v681_v61 = vpack.c.bf16 %v677_v55, %v675_v53 }
  0xd4   : > { %v704_v8 = vsel %vm703_vm5, %v688_v58, %v690_v59  ;;  %v720_v9 = vsel %vm703_vm5, %v690_v59, %v688_v58  ;;  %v2524_v58 = vld [vmem:[%s3672_s8 + $0x10] ss:$8 sm:$0x3] }
  0xd5   : > { %988 = vmatprep.subr.bf16.mxu0 %v682_v60  ;;  %v737_v16 = vmul.f32 %v730_v62, %v704_v8  ;;  %v738_v17 = vmul.f32 %v734_v63, %v720_v9  ;;  %v866_v8 = vrot.slane %v2524_v58, %v2987_v11  ;;  %v2723_v9 = vld [vmem:[%s3665_s1] ss:$12 sps:$4 sm:$0xff]  }
  0xd6   : > { %989 = vmatpush1.bf16.msra.mxu0 %v681_v61 }
  0xd7   : > { %v692_v10 = vpop.permute.xlu0 %691  ;;  %v694_v12 = vpop.permute.xlu1 %693 }
  0xd8   : > { %v705_v14 = vsel %vm703_vm5, %v692_v10, %v694_v12  ;;  %v721_v15 = vsel %vm703_vm5, %v694_v12, %v692_v10 }
  0xd9   : > { %v739_v18 = vmul.f32 %v730_v62, %v705_v14  ;;  %v740_v19 = vmul.f32 %v734_v63, %v721_v15  ;;  %v2726_v14 = vld [vmem:[%s3665_s1 + $0x1c] ss:$12 sps:$4 sm:$0xff]  }
  0xdb   : > { %v696_v20 = vpop.permute.xlu0 %695  ;;  %v698_v21 = vpop.permute.xlu1 %697  ;;  %v746_v23 = vpack.c.bf16 %v740_v19, %v738_v17  ;;  %v745_v24 = vpack.c.bf16 %v739_v18, %v737_v16 }
  0xdc   : > { %v706_v25 = vsel %vm703_vm5, %v696_v20, %v698_v21  ;;  %v722_v26 = vsel %vm703_vm5, %v698_v21, %v696_v20 }
  0xdd   : > { %990 = vmatprep.subr.bf16.mxu0 %v746_v23  ;;  %v741_v31 = vmul.f32 %v730_v62, %v706_v25  ;;  %v742_v32 = vmul.f32 %v734_v63, %v722_v26 }
  0xde   : > { %991 = vmatpush1.bf16.msra.mxu0 %v745_v24 }
  0xdf   : > { %v700_v27 = vpop.permute.xlu0 %699  ;;  %v702_v28 = vpop.permute.xlu1 %701 }
  0xe0   : > { %v707_v29 = vsel %vm703_vm5, %v700_v27, %v702_v28  ;;  %v723_v30 = vsel %vm703_vm5, %v702_v28, %v700_v27  ;;  %v2728_v28 = vld [vmem:[%s3665_s1 + $0x18] ss:$12 sps:$4 sm:$0xff]  }
  0xe1   : > { %v743_v33 = vmul.f32 %v730_v62, %v707_v29  ;;  %v744_v34 = vmul.f32 %v734_v63, %v723_v30  ;;  %v862_v63 = vrot.slane %v2524_v58, %v2996_v13 }
  0xe3   : > { %v754_v36 = vpop.permute.xlu0 %753  ;;  %v756_v37 = vpop.permute.xlu1 %755  ;;  %v748_v38 = vpack.c.bf16 %v744_v34, %v742_v32  ;;  %v747_v39 = vpack.c.bf16 %v743_v33, %v741_v31 }
  0xe4   : > { %v770_v2 = vsel %vm769_vm6, %v754_v36, %v756_v37  ;;  %v786_v41 = vsel %vm769_vm6, %v756_v37, %v754_v36 }
  0xe5   : > { %992 = vmatprep.subr.bf16.mxu0 %v748_v38  ;;  %v803_v44 = vmul.f32 %v796_v40, %v770_v2  ;;  %v804_v45 = vmul.f32 %v800_v0, %v786_v41  ;;  %v2730_v2 = vld [vmem:[%s3665_s1 + $0x20] ss:$12 sps:$4 sm:$0xff]  }
  0xe6   : > { %993 = vmatpush1.bf16.msra.mxu0 %v747_v39 }
  0xe7   : > { %v758_v42 = vpop.permute.xlu0 %757  ;;  %v760_v43 = vpop.permute.xlu1 %759 }
  0xe8   : > { %v771_v1 = vsel %vm769_vm6, %v758_v42, %v760_v43  ;;  %v787_v3 = vsel %vm769_vm6, %v760_v43, %v758_v42 }
  0xe9   : > { %v805_v46 = vmul.f32 %v796_v40, %v771_v1  ;;  %v806_v4 = vmul.f32 %v800_v0, %v787_v3 }
  0xeb   : > { %v762_v5 = vpop.permute.xlu0 %761  ;;  %v764_v47 = vpop.permute.xlu1 %763  ;;  %v812_v48 = vpack.c.bf16 %v806_v4, %v804_v45  ;;  %v811_v49 = vpack.c.bf16 %v805_v46, %v803_v44 }
  0xec   : > { %v772_v50 = vsel %vm769_vm6, %v762_v5, %v764_v47  ;;  %v788_v51 = vsel %vm769_vm6, %v764_v47, %v762_v5 }
  0xed   : > { %994 = vmatprep.subr.bf16.mxu0 %v812_v48  ;;  %v807_v54 = vmul.f32 %v796_v40, %v772_v50  ;;  %v808_v55 = vmul.f32 %v800_v0, %v788_v51 }
  0xee   : > { %995 = vmatpush1.bf16.msra.mxu0 %v811_v49  ;;  %v1084_v49 = vld [vmem:[%s3671_s7] sm:$0xff] }
  0xef   : > { %v766_v52 = vpop.permute.xlu0 %765  ;;  %v768_v6 = vpop.permute.xlu1 %767  ;;  %2608 = vmatprep.mubr.msk.f32.mxu1 %vm959_vm8, %v1084_v49 }
  0xf0   : > { %v773_v7 = vsel %vm769_vm6, %v766_v52, %v768_v6  ;;  %v789_v53 = vsel %vm769_vm6, %v768_v6, %v766_v52 }
  0xf1   : > { %v809_v56 = vmul.f32 %v796_v40, %v773_v7  ;;  %v810_v57 = vmul.f32 %v800_v0, %v789_v53  ;;  %v2729_v0 = vld [vmem:[%s3665_s1 + $0x8] ss:$12 sps:$4 sm:$0xff]  }
  0xf3   : > { %v820_v59 = vpop.permute.xlu0 %819  ;;  %v822_v60 = vpop.permute.xlu1 %821  ;;  %v814_v61 = vpack.c.bf16 %v810_v57, %v808_v55  ;;  %v813_v62 = vpack.c.bf16 %v809_v56, %v807_v54  ;;  %v1085_v54 = vld [vmem:[%s3671_s7 + $0x8] sm:$0xff]  ;;  %v1086_v55 = vld [vmem:[%s3671_s7 + $0x10] sm:$0xff]  ;;  %v1087_v56 = vld [vmem:[%s3671_s7 + $0x18] sm:$0xff] }
  0xf4   : > { %v836_v10 = vsel %vm835_vm7, %v820_v59, %v822_v60  ;;  %v852_v12 = vsel %vm835_vm7, %v822_v60, %v820_v59 }
  0xf5   : > { %996 = vmatprep.subr.bf16.mxu0 %v814_v61  ;;  %v869_v19 = vmul.f32 %v862_v63, %v836_v10  ;;  %v870_v20 = vmul.f32 %v866_v8, %v852_v12 }
  0xf6   : > { %997 = vmatpush1.bf16.msra.mxu0 %v813_v62 }
  0xf7   : > { %v824_v15 = vpop.permute.xlu0 %823  ;;  %v826_v16 = vpop.permute.xlu1 %825 }
  0xf8   : > { %v837_v17 = vsel %vm835_vm7, %v824_v15, %v826_v16  ;;  %v853_v18 = vsel %vm835_vm7, %v826_v16, %v824_v15 }
  0xf9   : > { %v871_v21 = vmul.f32 %v862_v63, %v837_v17  ;;  %v872_v23 = vmul.f32 %v866_v8, %v853_v18  ;;  %999 = vmatmul.mubr.bf16.vlgmr.msra.gmra.mrb[0].mxu0 %v2723_v9 }
  0xfa   : > { %1008 = vmatprep.mubr.bf16.mxu0 %v2726_v14 }
  0xfb   : > { %v877_v24 = vpack.c.bf16 %v871_v21, %v869_v19  ;;  %v828_v25 = vpop.permute.xlu0 %827  ;;  %v830_v26 = vpop.permute.xlu1 %829  ;;  %v878_v27 = vpack.c.bf16 %v872_v23, %v870_v20 }
  0xfc   : > { %v838_v29 = vsel %vm835_vm7, %v828_v25, %v830_v26  ;;  %v854_v30 = vsel %vm835_vm7, %v830_v26, %v828_v25 }
  0xfd   : > { %1019 = vmatprep.subr.bf16.mxu0 %v878_v27  ;;  %v873_v35 = vmul.f32 %v862_v63, %v838_v29  ;;  %v874_v36 = vmul.f32 %v866_v8, %v854_v30 }
  0xfe   : > { %1020 = vmatpush1.bf16.msra.mxu0 %v877_v24 }
  0xff   : > { %v832_v31 = vpop.permute.xlu0 %831  ;;  %v834_v32 = vpop.permute.xlu1 %833 }
 0x100   : > { %v839_v33 = vsel %vm835_vm7, %v832_v31, %v834_v32  ;;  %v855_v34 = vsel %vm835_vm7, %v834_v32, %v832_v31  ;;  %v1358_v32 = vld [vmem:[%s3667_s3] sm:$0xff] }
 0x101   : > { %v875_v37 = vmul.f32 %v862_v63, %v839_v33  ;;  %v876_v38 = vmul.f32 %v866_v8, %v855_v34  ;;  %1009 = vmatmul.mubr.bf16.gmra.mrb[4].mxu0 %v2728_v28  ;;  %v1359_v33 = vld [vmem:[%s3667_s3 + $0x8] sm:$0xff] }
 0x102   : > { %1051 = vmatprep.mubr.bf16.mxu0 %v2779_v22 }
 0x103   : > { %v879_v39 = vpack.c.bf16 %v875_v37, %v873_v35  ;;  %v880_v40 = vpack.c.bf16 %v876_v38, %v874_v36 }
 0x105   : > { %1021 = vmatprep.subr.bf16.mxu0 %v880_v40 }
 0x106   : > { %1022 = vmatpush1.bf16.msra.mxu0 %v879_v39 }
 0x109   : > { %2531 = vmatmul.mubr.msk.bf16.vlgmr.msra.gmra.mrb[0].mxu0 %vm959_vm8, %v2729_v0 }
 0x10a   : > { %1061 = vmatprep.mubr.bf16.mxu0 %v2779_v22 }
 0x111   : > { %2532 = vmatmul.mubr.msk.bf16.gmra.mrb[4].mxu0 %vm959_vm8, %v2730_v2 }
 0x1dc   : > { %v1053_v41 = vpop.f32.mrb[0].mxu0 }
 0x1dd   : > { %v1055_v42 = vpop.f32.mrb[1].mxu0 }
 0x1de   : > { %v1057_v43 = vpop.f32.mrb[2].mxu0  ;;  %v1072_v1 = vadd.f32 %v1055_v42, %v1053_v41 }
 0x1df   : > { %v1059_v3 = vpop.f32.mrb[3].mxu0 }
 0x1e0   : > { %1073 = vadd.xlane.f32.xlu0 %v1072_v1  ;;  %v1075_v44 = vadd.f32 %v1059_v3, %v1057_v43 }
 0x1e2   : > { %1076 = vadd.xlane.f32.xlu1 %v1075_v44  ;;  %v1323_v44 = vld [vmem:[%s3666_s2 + $0x8] sm:$0xff] }
 0x1e4   : > { %v1063_v45 = vpop.f32.mrb[4].mxu0 }
 0x1e5   : > { %v1065_v46 = vpop.f32.mrb[5].mxu0 }
 0x1e6   : > { %v1067_v4 = vpop.f32.mrb[6].mxu0  ;;  %v1078_v5 = vadd.f32 %v1065_v46, %v1063_v45 }
 0x1e7   : > { %v1069_v47 = vpop.f32.mrb[7].mxu0 }
 0x1e8   : > { %1079 = vadd.xlane.f32.xlu0 %v1078_v5  ;;  %v1081_v48 = vadd.f32 %v1069_v47, %v1067_v4 }
 0x1ec   : > { %1082 = vadd.xlane.f32.xlu0 %v1081_v48  ;;  %v1325_v48 = vld [vmem:[%s3666_s2 + $0x18] sm:$0xff] }
 0x26d   : > { %v1074_v50 = vpop.xlane.xlu0 %1073 }
 0x26f   : > { %v1077_v51 = vpop.xlane.xlu1 %1076 }
 0x270   : > { %v2656_v52 = vpack.c.bf16 %v1077_v51, %v1074_v50  ;;  %v1360_v50 = vld [vmem:[%s3667_s3 + $0x10] sm:$0xff] }
 0x272   : > { %2657 = vmatprep.subr.bf16.mxu1 %v2656_v52 }
 0x273   : > { %2659 = vmatpush3.bf16.msra.mxu1 %v2656_v52 }
 0x275   : > { %v1080_v6 = vpop.xlane.xlu0 %1079 }
 0x279   : > { %v1083_v7 = vpop.xlane.xlu0 %1082 }
 0x27a   : > { %v2660_v53 = vpack.c.bf16 %v1083_v7, %v1080_v6  ;;  %v1324_v6 = vld [vmem:[%s3666_s2 + $0x10] sm:$0xff] }
 0x27c   : > { %2661 = vmatprep.subr.bf16.mxu1 %v2660_v53 }
 0x27d   : > { %2663 = vmatpush3.bf16.msra.mxu1 %v2660_v53  ;;  %v1361_v53 = vld [vmem:[%s3667_s3 + $0x18] sm:$0xff] }
 0x280   : > { %2609 = vmatmul.mubr.msk.f32.vlgmr.msra.gmra.mrb[0].mxu1 %vm959_vm8, %v1085_v54 }
 0x281   : > { %2611 = vmatprep.mubr.msk.f32.mxu1 %vm959_vm8, %v1086_v55 }
 0x284   : > { %2612 = vmatmul.mubr.msk.f32.gmra.mrb[2].mxu1 %vm959_vm8, %v1087_v56 }
 0x285   : > { %2622 = vmatprep.mubr.msk.f32.mxu1 %vm959_vm8, %v1084_v49 }
 0x353   : > { %v2610_v57 = vpop.f32.mrb[0].mxu1 }
 0x354   : > { %1192 = vperm.xlu0 %2721, %v2610_v57   ;;  %v1166_v58 = vpop.f32.mrb[1].mxu1 }
 0x355   : > { %1187 = vperm.xlu1 %2722, %v1166_v58  }
 0x357   : > { %v2613_v59 = vpop.f32.mrb[2].mxu1 }
 0x358   : > { %v1176_v60 = vpop.f32.mrb[3].mxu1 }
 0x359   : > { %1197 = vperm.xlu1 %2722, %v1176_v60  }
 0x35d   : > { %1202 = vperm.xlu1 %2722, %v2613_v59  }
 0x3d3   : > { %v1193_v61 = vpop.permute.xlu0 %1192 }
 0x3d4   : > { %v3157_v62 = vsub.f32 %v1057_v43, %v1193_v61  ;;  %v3159_v63 = vsub.f32 %v1059_v3, %v1193_v61  ;;  %v1188_v8 = vpop.permute.xlu1 %1187 }
 0x3d5   : > { %v3161_v9 = vsub.f32 %v1053_v41, %v1188_v8  ;;  %v3163_v10 = vsub.f32 %v1055_v42, %v1188_v8 }
 0x3d6   : > { %v1215_v12 = vmul.f32 %v3157_v62, %v3157_v62  ;;  %v1216_v14 = vmul.f32 %v3159_v63, %v3159_v63 }
 0x3d7   : > { %v1213_v15 = vmul.f32 %v3161_v9, %v3161_v9  ;;  %v1214_v16 = vmul.f32 %v3163_v10, %v3163_v10 }
 0x3d8   : > { %v1198_v17 = vpop.permute.xlu1 %1197  ;;  %v1224_v18 = vadd.f32 %v1216_v14, %v1215_v12 }
 0x3d9   : > { %v3173_v19 = vsub.f32 %v1063_v45, %v1198_v17  ;;  %v3175_v20 = vsub.f32 %v1065_v46, %v1198_v17  ;;  %v1221_v21 = vadd.f32 %v1214_v16, %v1213_v15  ;;  %v1322_v45 = vld [vmem:[%s3666_s2] sm:$0xff] }
 0x3da   : > { %1225 = vadd.xlane.f32.xlu0 %v1224_v18 }
 0x3db   : > { %1222 = vadd.xlane.f32.xlu1 %v1221_v21  ;;  %v1217_v23 = vmul.f32 %v3173_v19, %v3173_v19  ;;  %v1218_v24 = vmul.f32 %v3175_v20, %v3175_v20 }
 0x3dc   : > { %v1203_v25 = vpop.permute.xlu1 %1202 }
 0x3dd   : > { %v3181_v26 = vsub.f32 %v1067_v4, %v1203_v25  ;;  %v3183_v27 = vsub.f32 %v1069_v47, %v1203_v25  ;;  %v1227_v28 = vadd.f32 %v1218_v24, %v1217_v23 }
 0x3df   : > { %1228 = vadd.xlane.f32.xlu1 %v1227_v28  ;;  %v1219_v29 = vmul.f32 %v3181_v26, %v3181_v26  ;;  %v1220_v30 = vmul.f32 %v3183_v27, %v3183_v27 }
 0x3e1   : > { %v1230_v31 = vadd.f32 %v1220_v30, %v1219_v29 }
 0x3e3   : > { %1231 = vadd.xlane.f32.xlu1 %v1230_v31 }
 0x3f4   : > { %1364 = vperm.xlu1 %2722, %v1358_v32  }
 0x3f8   : > { %1369 = vperm.xlu1 %2722, %v1359_v33   ;;  %v2733_v33 = vld [vmem:[%s3668_s4 + $0x4] ss:$12 sps:$4 sm:$0xff]  }
 0x467   : > { %v1226_v34 = vpop.xlane.xlu0 %1225 }
 0x468   : > { %v1223_v35 = vpop.xlane.xlu1 %1222 }
 0x469   : > { %v2664_v36 = vpack.c.bf16 %v1226_v34, %v1223_v35 }
 0x46b   : > { %2665 = vmatprep.subr.bf16.mxu1 %v2664_v36 }
 0x46c   : > { %2667 = vmatpush3.bf16.msra.mxu1 %v2664_v36  ;;  %v1229_v37 = vpop.xlane.xlu1 %1228  ;;  %v1442_v36 = vld [vmem:[%s3672_s8] ss:$8 sm:$0x3] }
 0x470   : > { %v1232_v38 = vpop.xlane.xlu1 %1231 }
 0x471   : > { %v2668_v39 = vpack.c.bf16 %v1232_v38, %v1229_v37 }
 0x473   : > { %2669 = vmatprep.subr.bf16.mxu1 %v2668_v39 }
 0x474   : > { %2671 = vmatpush3.bf16.msra.mxu1 %v2668_v39  ;;  %v1447_v39 = vrot.slane %v1442_v36, %v2996_v13 }
 0x477   : > { %2623 = vmatmul.mubr.msk.f32.vlgmr.msra.gmra.mrb[4].mxu1 %vm959_vm8, %v1085_v54  ;;  %v1365_v54 = vpop.permute.xlu1 %1364 }
 0x478   : > { %2625 = vmatprep.mubr.msk.f32.mxu1 %vm959_vm8, %v1086_v55 }
 0x47b   : > { %2626 = vmatmul.mubr.msk.f32.gmra.mrb[6].mxu1 %vm959_vm8, %v1087_v56  ;;  %v1370_v55 = vpop.permute.xlu1 %1369 }
 0x47c   : > { %2038 = vmatprep.mubr.bf16.mxu1 %v2733_v33 }
 0x54a   : > { %v2624_v40 = vpop.f32.mrb[4].mxu1 }
 0x54b   : > { %v1305_v0 = vadd.f32 1e-05, %v2624_v40  ;;  %v1299_v2 = vpop.f32.mrb[5].mxu1  ;;  %v1451_v40 = vrot.slane %v1442_v36, %v2987_v11 }
 0x54c   : > { %v1300_v41 = vadd.f32 1e-05, %v1299_v2 }
 0x54d   : > { %2739 = vrsqrt.f32 %v1305_v0 }
 0x54e   : > { %2741 = vrsqrt.f32 %v1300_v41  ;;  %v2627_v42 = vpop.f32.mrb[6].mxu1 }
 0x54f   : > { %v1315_v43 = vadd.f32 1e-05, %v2627_v42  ;;  %v1309_v1 = vpop.f32.mrb[7].mxu1 }
 0x550   : > { %v1310_v3 = vadd.f32 1e-05, %v1309_v1 }
 0x551   : > { %2743 = vrsqrt.f32 %v1315_v43 }
 0x552   : > { %2745 = vrsqrt.f32 %v1310_v3 }
 0x557   : > { %v2740_v46 = vpop.eup %2739 }
 0x558   : > { %v2742_v4 = vpop.eup %2741  ;;  %v1327_v5 = vmul.f32 %v2740_v46, %v1323_v44 }
 0x559   : > { %v1326_v47 = vmul.f32 %v2742_v4, %v1322_v45 }
 0x55a   : > { %1337 = vperm.xlu0 %2721, %v1327_v5  }
 0x55b   : > { %v2744_v49 = vpop.eup %2743  ;;  %1332 = vperm.xlu1 %2722, %v1326_v47  }
 0x55c   : > { %v2746_v51 = vpop.eup %2745  ;;  %v1329_v52 = vmul.f32 %v2744_v49, %v1325_v48 }
 0x55d   : > { %v1328_v7 = vmul.f32 %v2746_v51, %v1324_v6 }
 0x55e   : > { %1374 = vperm.xlu0 %2721, %v1360_v50  }
 0x55f   : > { %1347 = vperm.xlu1 %2722, %v1329_v52  }
 0x563   : > { %1342 = vperm.xlu1 %2722, %v1328_v7  }
 0x567   : > { %1379 = vperm.xlu1 %2722, %v1361_v53  }
 0x5d9   : > { %v1338_v56 = vpop.permute.xlu0 %1337 }
 0x5da   : > { %v1352_v57 = vmul.f32 %v1338_v56, %v3157_v62  ;;  %v1353_v58 = vmul.f32 %v1338_v56, %v3159_v63  ;;  %v1333_v59 = vpop.permute.xlu1 %1332 }
 0x5db   : > { %v1351_v60 = vmul.f32 %v1333_v59, %v3163_v10  ;;  %v1350_v15 = vmul.f32 %v1333_v59, %v3161_v9 }
 0x5dc   : > { %v1384_v61 = vadd.f32 %v1370_v55, %v1352_v57  ;;  %v1385_v8 = vadd.f32 %v1370_v55, %v1353_v58 }
 0x5dd   : > { %v1383_v16 = vadd.f32 %v1365_v54, %v1351_v60  ;;  %v1382_v62 = vadd.f32 %v1365_v54, %v1350_v15  ;;  %v1375_v29 = vpop.permute.xlu0 %1374  ;;  %v2541_v15 = vld [vmem:[%s3672_s8 + $0x1] ss:$8 sm:$0x3] }
 0x5de   : > { %v3219_v12 = vmax.f32 %v1384_v61, 0.0  ;;  %v3221_v14 = vmax.f32 %v1385_v8, 0.0  ;;  %v1348_v9 = vpop.permute.xlu1 %1347 }
 0x5df   : > { %v3228_v63 = vmax.f32 %v1383_v16, 0.0  ;;  %v3234_v10 = vmax.f32 %v1382_v62, 0.0  ;;  %v1356_v21 = vmul.f32 %v1348_v9, %v3181_v26  ;;  %v1357_v23 = vmul.f32 %v1348_v9, %v3183_v27 }
 0x5e0   : > { %1404 = vrot.lane.b32.xlu1 %v3221_v14, %s2771_s15  ;;  %1674 = vrot.lane.b32.xlu0 %v3219_v12, %s2775_s19 }
 0x5e2   : > { %v1343_v17 = vpop.permute.xlu1 %1342 }
 0x5e3   : > { %v1355_v24 = vmul.f32 %v1343_v17, %v3175_v20  ;;  %v1354_v26 = vmul.f32 %v1343_v17, %v3173_v19  ;;  %v1515_v17 = vrot.slane %v2541_v15, %v2987_v11 }
 0x5e4   : > { %1420 = vrot.lane.b32.xlu1 %v3219_v12, %s2771_s15  ;;  %1402 = vrot.lane.b32.xlu0 %v3228_v63, %s2771_s15 }
 0x5e5   : > { %v1387_v27 = vadd.f32 %v1375_v29, %v1355_v24  ;;  %v1386_v20 = vadd.f32 %v1375_v29, %v1354_v26 }
 0x5e6   : > { %v1380_v18 = vpop.permute.xlu1 %1379 }
 0x5e7   : > { %v1388_v25 = vadd.f32 %v1380_v18, %v1356_v21  ;;  %v1389_v28 = vadd.f32 %v1380_v18, %v1357_v23  ;;  %v3284_v32 = vmax.f32 %v1387_v27, 0.0  ;;  %v3290_v19 = vmax.f32 %v1386_v20, 0.0 }
 0x5e8   : > { %1472 = vrot.lane.b32.xlu1 %v3221_v14, %s2772_s16  ;;  %1418 = vrot.lane.b32.xlu0 %v3234_v10, %s2771_s15  ;;  %v1511_v23 = vrot.slane %v2541_v15, %v2996_v13 }
 0x5e9   : > { %v3276_v30 = vmax.f32 %v1388_v25, 0.0  ;;  %v3278_v31 = vmax.f32 %v1389_v28, 0.0 }
 0x5ec   : > { %1484 = vrot.lane.b32.xlu1 %v3219_v12, %s2772_s16  ;;  %1470 = vrot.lane.b32.xlu0 %v3228_v63, %s2772_s16 }
 0x5f0   : > { %1536 = vrot.lane.b32.xlu1 %v3221_v14, %s2773_s17  ;;  %1482 = vrot.lane.b32.xlu0 %v3234_v10, %s2772_s16 }
 0x5f4   : > { %1548 = vrot.lane.b32.xlu1 %v3219_v12, %s2773_s17  ;;  %1534 = vrot.lane.b32.xlu0 %v3228_v63, %s2773_s17 }
 0x5f8   : > { %1600 = vrot.lane.b32.xlu1 %v3221_v14, %s2774_s18  ;;  %1546 = vrot.lane.b32.xlu0 %v3234_v10, %s2773_s17 }
 0x5fc   : > { %1612 = vrot.lane.b32.xlu1 %v3219_v12, %s2774_s18  ;;  %1598 = vrot.lane.b32.xlu0 %v3228_v63, %s2774_s18 }
 0x600   : > { %1676 = vrot.lane.b32.xlu1 %v3221_v14, %s2775_s19  ;;  %1610 = vrot.lane.b32.xlu0 %v3234_v10, %s2774_s18 }
 0x604   : > { %1672 = vrot.lane.b32.xlu1 %v3228_v63, %s2775_s19  ;;  %1670 = vrot.lane.b32.xlu0 %v3234_v10, %s2775_s19 }
 0x608   : > { %1736 = vrot.lane.b32.xlu1 %v3228_v63, %s2776_s20  ;;  %1734 = vrot.lane.b32.xlu0 %v3234_v10, %s2776_s20 }
 0x60c   : > { %1408 = vrot.lane.b32.xlu1 %v3278_v31, %s2771_s15  ;;  %1682 = vrot.lane.b32.xlu0 %v3276_v30, %s2775_s19 }
 0x610   : > { %1406 = vrot.lane.b32.xlu0 %v3284_v32, %s2771_s15  ;;  %1424 = vrot.lane.b32.xlu1 %v3276_v30, %s2771_s15 }
 0x614   : > { %1422 = vrot.lane.b32.xlu0 %v3290_v19, %s2771_s15  ;;  %1476 = vrot.lane.b32.xlu1 %v3278_v31, %s2772_s16 }
 0x618   : > { %1474 = vrot.lane.b32.xlu0 %v3284_v32, %s2772_s16  ;;  %1488 = vrot.lane.b32.xlu1 %v3276_v30, %s2772_s16 }
 0x61c   : > { %1486 = vrot.lane.b32.xlu0 %v3290_v19, %s2772_s16  ;;  %1540 = vrot.lane.b32.xlu1 %v3278_v31, %s2773_s17 }
 0x620   : > { %1538 = vrot.lane.b32.xlu0 %v3284_v32, %s2773_s17  ;;  %1552 = vrot.lane.b32.xlu1 %v3276_v30, %s2773_s17 }
 0x624   : > { %1550 = vrot.lane.b32.xlu0 %v3290_v19, %s2773_s17  ;;  %1604 = vrot.lane.b32.xlu1 %v3278_v31, %s2774_s18 }
 0x628   : > { %1602 = vrot.lane.b32.xlu0 %v3284_v32, %s2774_s18  ;;  %1616 = vrot.lane.b32.xlu1 %v3276_v30, %s2774_s18 }
 0x62c   : > { %1614 = vrot.lane.b32.xlu0 %v3290_v19, %s2774_s18  ;;  %1684 = vrot.lane.b32.xlu1 %v3278_v31, %s2775_s19  ;;  %s3641_s18 = scalar_lea.vmem %s3673_s9, %s2566_s11 }
 0x630   : > { %1738 = vrot.lane.b32.xlu0 %v3219_v12, %s2776_s20  ;;  %1740 = vrot.lane.b32.xlu1 %v3221_v14, %s2776_s20 }
 0x634   : > { %1746 = vrot.lane.b32.xlu0 %v3276_v30, %s2776_s20  ;;  %1748 = vrot.lane.b32.xlu1 %v3278_v31, %s2776_s20 }
 0x638   : > { %1798 = vrot.lane.b32.xlu0 %v3234_v10, %s2777_s21  ;;  %1800 = vrot.lane.b32.xlu1 %v3228_v63, %s2777_s21 }
 0x63c   : > { %1678 = vrot.lane.b32.xlu0 %v3290_v19, %s2775_s19  ;;  %1680 = vrot.lane.b32.xlu1 %v3284_v32, %s2775_s19 }
 0x640   : > { %1802 = vrot.lane.b32.xlu0 %v3219_v12, %s2777_s21  ;;  %1804 = vrot.lane.b32.xlu1 %v3221_v14, %s2777_s21 }
 0x644   : > { %1742 = vrot.lane.b32.xlu0 %v3290_v19, %s2776_s20  ;;  %1744 = vrot.lane.b32.xlu1 %v3284_v32, %s2776_s20 }
 0x648   : > { %1810 = vrot.lane.b32.xlu0 %v3276_v30, %s2777_s21  ;;  %1812 = vrot.lane.b32.xlu1 %v3278_v31, %s2777_s21 }
 0x64c   : > { %1806 = vrot.lane.b32.xlu0 %v3290_v19, %s2777_s21  ;;  %1808 = vrot.lane.b32.xlu1 %v3284_v32, %s2777_s21 }
 0x650   : > { %1862 = vrot.lane.b32.xlu0 %v3234_v10, %s2778_s24  ;;  %1864 = vrot.lane.b32.xlu1 %v3228_v63, %s2778_s24 }
 0x652   : > { %v3359_v34 = vpop.permute.xlu0 %1674  ;;  %v1405_v35 = vpop.permute.xlu1 %1404 }
 0x654   : > { %1866 = vrot.lane.b32.xlu0 %v3219_v12, %s2778_s24  ;;  %1868 = vrot.lane.b32.xlu1 %v3221_v14, %s2778_s24 }
 0x656   : > { %v1403_v37 = vpop.permute.xlu0 %1402  ;;  %v1421_v38 = vpop.permute.xlu1 %1420 }
 0x657   : > { %v1439_v0 = vsel %vm370_vm0, %v1405_v35, %v1421_v38  ;;  %v1427_v2 = vsel %vm370_vm0, %v1421_v38, %v1405_v35 }
 0x658   : > { %1870 = vrot.lane.b32.xlu0 %v3290_v19, %s2778_s24  ;;  %1872 = vrot.lane.b32.xlu1 %v3284_v32, %s2778_s24  ;;  %v1456_v43 = vmul.f32 %v1447_v39, %v1439_v0  ;;  %v1457_v44 = vmul.f32 %v1451_v40, %v1427_v2 }
 0x65a   : > { %v1419_v41 = vpop.permute.xlu0 %1418  ;;  %v1473_v42 = vpop.permute.xlu1 %1472 }
 0x65b   : > { %v1426_v1 = vsel %vm370_vm0, %v1419_v41, %v1403_v37  ;;  %v1438_v3 = vsel %vm370_vm0, %v1403_v37, %v1419_v41  ;;  %v2542_v41 = vld [vmem:[%s3672_s8 + $0x2] ss:$8 sm:$0x3] }
 0x65c   : > { %v1454_v45 = vmul.f32 %v1447_v39, %v1438_v3  ;;  %v1455_v46 = vmul.f32 %v1451_v40, %v1426_v1  ;;  %1874 = vrot.lane.b32.xlu0 %v3276_v30, %s2778_s24  ;;  %1876 = vrot.lane.b32.xlu1 %v3278_v31, %s2778_s24 }
 0x65e   : > { %v1462_v4 = vpack.c.bf16 %v1456_v43, %v1454_v45  ;;  %v1471_v5 = vpop.permute.xlu0 %1470  ;;  %v1485_v47 = vpop.permute.xlu1 %1484  ;;  %v1463_v48 = vpack.c.bf16 %v1457_v44, %v1455_v46 }
 0x65f   : > { %v1491_v24 = vsel %vm435_vm1, %v1485_v47, %v1473_v42  ;;  %v1503_v38 = vsel %vm435_vm1, %v1473_v42, %v1485_v47  ;;  %v1575_v47 = vrot.slane %v2542_v41, %v2996_v13 }
 0x660   : > { %2006 = vmatprep.subr.bf16.mxu1 %v1463_v48  ;;  %v1521_v0 = vmul.f32 %v1515_v17, %v1491_v24  ;;  %v1520_v45 = vmul.f32 %v1511_v23, %v1503_v38 }
 0x661   : > { %2007 = vmatpush1.bf16.msra.mxu1 %v1462_v4 }
 0x662   : > { %v1483_v49 = vpop.permute.xlu0 %1482  ;;  %v3382_v50 = vpop.permute.xlu1 %1536 }
 0x663   : > { %v1490_v9 = vsel %vm435_vm1, %v1483_v49, %v1471_v5  ;;  %v1502_v29 = vsel %vm435_vm1, %v1471_v5, %v1483_v49 }
 0x664   : > { %v1519_v26 = vmul.f32 %v1515_v17, %v1490_v9  ;;  %v1518_v2 = vmul.f32 %v1511_v23, %v1502_v29 }
 0x666   : > { %v1535_v51 = vpop.permute.xlu0 %1534  ;;  %v3384_v52 = vpop.permute.xlu1 %1548  ;;  %v1527_v4 = vpack.c.bf16 %v1521_v0, %v1519_v26  ;;  %v1526_v5 = vpack.c.bf16 %v1520_v45, %v1518_v2 }
 0x667   : > { %v1555_v48 = vsel %vm501_vm2, %v3384_v52, %v3382_v50 }
 0x66a   : > { %v1547_v6 = vpop.permute.xlu0 %1546  ;;  %v3386_v7 = vpop.permute.xlu1 %1600 }
 0x66b   : > { %v1554_v46 = vsel %vm501_vm2, %v1547_v6, %v1535_v51  ;;  %v1566_v15 = vsel %vm501_vm2, %v1535_v51, %v1547_v6  ;;  %v2543_v51 = vld [vmem:[%s3672_s8 + $0x3] ss:$8 sm:$0x3] }
 0x66c   : > { %v1582_v26 = vmul.f32 %v1575_v47, %v1566_v15 }
 0x66e   : > { %v3388_v53 = vpop.permute.xlu0 %1598  ;;  %v3390_v54 = vpop.permute.xlu1 %1612 }
 0x66f   : > { %v1619_v38 = vsel %vm567_vm3, %v3390_v54, %v3386_v7 }
 0x672   : > { %v3392_v55 = vpop.permute.xlu0 %1610  ;;  %v3394_v56 = vpop.permute.xlu1 %1676 }
 0x676   : > { %v3396_v57 = vpop.permute.xlu0 %1670  ;;  %v3398_v58 = vpop.permute.xlu1 %1672 }
 0x67a   : > { %v3400_v59 = vpop.permute.xlu0 %1734  ;;  %v3402_v60 = vpop.permute.xlu1 %1736 }
 0x67e   : > { %v3404_v61 = vpop.permute.xlu0 %1682  ;;  %v1409_v8 = vpop.permute.xlu1 %1408 }
 0x682   : > { %v1407_v16 = vpop.permute.xlu0 %1406  ;;  %v1425_v62 = vpop.permute.xlu1 %1424 }
 0x683   : > { %v1429_v18 = vsel %vm370_vm0, %v1425_v62, %v1409_v8  ;;  %v1441_v21 = vsel %vm370_vm0, %v1409_v8, %v1425_v62 }
 0x684   : > { %v1460_v33 = vmul.f32 %v1447_v39, %v1441_v21  ;;  %v1461_v35 = vmul.f32 %v1451_v40, %v1429_v18 }
 0x686   : > { %v1423_v25 = vpop.permute.xlu0 %1422  ;;  %v1477_v28 = vpop.permute.xlu1 %1476 }
 0x687   : > { %v1428_v27 = vsel %vm370_vm0, %v1423_v25, %v1407_v16  ;;  %v1440_v20 = vsel %vm370_vm0, %v1407_v16, %v1423_v25 }
 0x688   : > { %v1458_v36 = vmul.f32 %v1447_v39, %v1440_v20  ;;  %v1459_v37 = vmul.f32 %v1451_v40, %v1428_v27  ;;  %v1579_v39 = vrot.slane %v2542_v41, %v2987_v11  ;;  %v1630_v41 = vsel %vm567_vm3, %v3388_v53, %v3392_v55 }
 0x68a   : > { %v1464_v43 = vpack.c.bf16 %v1460_v33, %v1458_v36  ;;  %v1475_v1 = vpop.permute.xlu0 %1474  ;;  %v1489_v3 = vpop.permute.xlu1 %1488  ;;  %v1465_v44 = vpack.c.bf16 %v1461_v35, %v1459_v37  ;;  %v1583_v16 = vmul.f32 %v1579_v39, %v1554_v46  ;;  %v1585_v29 = vmul.f32 %v1579_v39, %v1555_v48 }
 0x68b   : > { %v1493_v40 = vsel %vm435_vm1, %v1489_v3, %v1477_v28  ;;  %v1505_v42 = vsel %vm435_vm1, %v1477_v28, %v1489_v3  ;;  %v1567_v28 = vsel %vm501_vm2, %v3382_v50, %v3384_v52  ;;  %v1643_v50 = vrot.slane %v2543_v51, %v2987_v11 }
 0x68c   : > { %2008 = vmatprep.subr.bf16.mxu1 %v1465_v44  ;;  %v1524_v18 = vmul.f32 %v1511_v23, %v1505_v42  ;;  %v1525_v21 = vmul.f32 %v1515_v17, %v1493_v40  ;;  %v1584_v35 = vmul.f32 %v1575_v47, %v1567_v28  ;;  %v1639_v40 = vrot.slane %v2543_v51, %v2996_v13 }
 0x68d   : > { %2009 = vmatpush1.bf16.msra.mxu1 %v1464_v43  ;;  %v1631_v42 = vsel %vm567_vm3, %v3386_v7, %v3390_v54 }
 0x68e   : > { %v1487_v49 = vpop.permute.xlu0 %1486  ;;  %2010 = vmatprep.subr.bf16.mxu1 %v1527_v4  ;;  %v1541_v8 = vpop.permute.xlu1 %1540  ;;  %v1590_v37 = vpack.c.bf16 %v1584_v35, %v1582_v26 }
 0x68f   : > { %v1492_v62 = vsel %vm435_vm1, %v1487_v49, %v1475_v1  ;;  %v1504_v9 = vsel %vm435_vm1, %v1475_v1, %v1487_v49 }
 0x690   : > { %v1522_v24 = vmul.f32 %v1511_v23, %v1504_v9  ;;  %v1523_v25 = vmul.f32 %v1515_v17, %v1492_v62  ;;  %v1618_v17 = vsel %vm567_vm3, %v3392_v55, %v3388_v53  ;;  %v1591_v23 = vpack.c.bf16 %v1585_v29, %v1583_v16 }
 0x691   : > { %2011 = vmatpush1.bf16.msra.mxu1 %v1526_v5  ;;  %v1647_v43 = vmul.f32 %v1643_v50, %v1618_v17  ;;  %v1649_v5 = vmul.f32 %v1643_v50, %v1619_v38  ;;  %v1648_v16 = vmul.f32 %v1639_v40, %v1631_v42  ;;  %v1687_v38 = vsel %vm637_vm4, %v3359_v34, %v3394_v56 }
 0x692   : > { %v1528_v6 = vpack.c.bf16 %v1524_v18, %v1522_v24  ;;  %v1539_v27 = vpop.permute.xlu0 %1538  ;;  %v1553_v20 = vpop.permute.xlu1 %1552  ;;  %v1529_v33 = vpack.c.bf16 %v1525_v21, %v1523_v25 }
 0x693   : > { %v1557_v52 = vsel %vm501_vm2, %v1553_v20, %v1541_v8  ;;  %v1569_v36 = vsel %vm501_vm2, %v1541_v8, %v1553_v20  ;;  %v1646_v8 = vmul.f32 %v1639_v40, %v1630_v41  ;;  %v1655_v15 = vpack.c.bf16 %v1649_v5, %v1647_v43 }
 0x694   : > { %2012 = vmatprep.subr.bf16.mxu1 %v1529_v33  ;;  %v1588_v44 = vmul.f32 %v1575_v47, %v1569_v36  ;;  %v1589_v45 = vmul.f32 %v1579_v39, %v1557_v52  ;;  %v1663_v20 = vpack.c.bf16 %v3221_v14, %v3228_v63  ;;  %v1702_v33 = vsel %vm637_vm4, %v3398_v58, %v3396_v57 }
 0x695   : > { %2013 = vmatpush1.bf16.msra.mxu1 %v1528_v6  ;;  %v1654_v18 = vpack.c.bf16 %v1648_v16, %v1646_v8  ;;  %v1686_v52 = vsel %vm637_vm4, %v3396_v57, %v3398_v58  ;;  %v1662_v14 = vpack.c.bf16 %v3219_v12, %v3234_v10  ;;  %v2545_v12 = vld [vmem:[%s3672_s8 + $0x6] ss:$8 sm:$0x3]  ;;  %v1664_v10 = vpack.c.bf16 %v3276_v30, %v3290_v19 }
 0x696   : > { %v1551_v0 = vpop.permute.xlu0 %1550  ;;  %2014 = vmatprep.subr.bf16.mxu1 %v1591_v23  ;;  %v1605_v2 = vpop.permute.xlu1 %1604  ;;  %v1766_v30 = vsel %vm703_vm5, %v3402_v60, %v3400_v59 }
 0x697   : > { %v1556_v1 = vsel %vm501_vm2, %v1551_v0, %v1539_v27  ;;  %v1568_v3 = vsel %vm501_vm2, %v1539_v27, %v1551_v0  ;;  %v2544_v27 = vld [vmem:[%s3672_s8 + $0x5] ss:$8 sm:$0x3] }
 0x698   : > { %v1586_v46 = vmul.f32 %v1575_v47, %v1568_v3  ;;  %v1587_v4 = vmul.f32 %v1579_v39, %v1556_v1  ;;  %v1715_v35 = vrot.slane %v2544_v27, %v2987_v11  ;;  %v1711_v63 = vrot.slane %v2544_v27, %v2996_v13 }
 0x699   : > { %2015 = vmatpush1.bf16.msra.mxu1 %v1590_v37  ;;  %v1665_v37 = vpack.c.bf16 %v3278_v31, %v3284_v32  ;;  %v1775_v1 = vrot.slane %v2545_v12, %v2996_v13  ;;  %v1779_v3 = vrot.slane %v2545_v12, %v2987_v11 }
 0x69a   : > { %v1592_v48 = vpack.c.bf16 %v1588_v44, %v1586_v46  ;;  %v1603_v49 = vpop.permute.xlu0 %1602  ;;  %v1617_v53 = vpop.permute.xlu1 %1616  ;;  %v1593_v55 = vpack.c.bf16 %v1589_v45, %v1587_v4  ;;  %v1719_v36 = vmul.f32 %v1715_v35, %v1702_v33  ;;  %v1720_v57 = vmul.f32 %v1711_v63, %v1687_v38 }
 0x69b   : > { %v1621_v62 = vsel %vm567_vm3, %v1617_v53, %v1605_v2  ;;  %v1633_v39 = vsel %vm567_vm3, %v1605_v2, %v1617_v53  ;;  %v1718_v2 = vmul.f32 %v1711_v63, %v1686_v52  ;;  %v1783_v53 = vmul.f32 %v1779_v3, %v1766_v30 }
 0x69c   : > { %2016 = vmatprep.subr.bf16.mxu1 %v1593_v55  ;;  %v1652_v21 = vmul.f32 %v1639_v40, %v1633_v39  ;;  %v1653_v24 = vmul.f32 %v1643_v50, %v1621_v62 }
 0x69d   : > { %2017 = vmatpush1.bf16.msra.mxu1 %v1592_v48  ;;  %v1726_v58 = vpack.c.bf16 %v1720_v57, %v1718_v2 }
 0x69e   : > { %v1615_v47 = vpop.permute.xlu0 %1614  ;;  %2018 = vmatprep.subr.bf16.mxu1 %v1655_v15  ;;  %v1685_v9 = vpop.permute.xlu1 %1684 }
 0x69f   : > { %v1620_v7 = vsel %vm567_vm3, %v1615_v47, %v1603_v49  ;;  %v1632_v54 = vsel %vm567_vm3, %v1603_v49, %v1615_v47  ;;  %v1689_v31 = vsel %vm637_vm4, %v3404_v61, %v1685_v9  ;;  %v1750_v49 = vsel %vm703_vm5, %v3400_v59, %v3402_v60  ;;  %v2546_v47 = vld [vmem:[%s3672_s8 + $0x7] ss:$8 sm:$0x3] }
 0x6a0   : > { %v1650_v25 = vmul.f32 %v1639_v40, %v1632_v54  ;;  %v1651_v28 = vmul.f32 %v1643_v50, %v1620_v7  ;;  %v1703_v50 = vsel %vm637_vm4, %v3394_v56, %v3359_v34  ;;  %v1705_v34 = vsel %vm637_vm4, %v1685_v9, %v3404_v61 }
 0x6a1   : > { %2019 = vmatpush1.bf16.msra.mxu1 %v1654_v18  ;;  %v1721_v0 = vmul.f32 %v1715_v35, %v1703_v50  ;;  %v1724_v45 = vmul.f32 %v1711_v63, %v1689_v31  ;;  %v1725_v40 = vmul.f32 %v1715_v35, %v1705_v34  ;;  %v1782_v9 = vmul.f32 %v1775_v1, %v1750_v49 }
 0x6a2   : > { %v1656_v29 = vpack.c.bf16 %v1652_v21, %v1650_v25  ;;  %v1739_v26 = vpop.permute.xlu0 %1738  ;;  %v1741_v51 = vpop.permute.xlu1 %1740  ;;  %v1657_v6 = vpack.c.bf16 %v1653_v24, %v1651_v28  ;;  %v1843_v21 = vrot.slane %v2546_v47, %v2987_v11 }
 0x6a3   : > { %v1727_v32 = vpack.c.bf16 %v1721_v0, %v1719_v36  ;;  %v1767_v56 = vsel %vm703_vm5, %v1741_v51, %v1739_v26  ;;  %v1751_v46 = vsel %vm703_vm5, %v1739_v26, %v1741_v51 }
 0x6a4   : > { %2020 = vmatprep.subr.bf16.mxu1 %v1657_v6  ;;  %v1785_v42 = vmul.f32 %v1779_v3, %v1767_v56  ;;  %v1784_v55 = vmul.f32 %v1775_v1, %v1751_v46  ;;  %v2731_v46 = vld [vmem:[%s3668_s4] ss:$12 sps:$4 sm:$0xff]  }
 0x6a5   : > { %2021 = vmatpush1.bf16.msra.mxu1 %v1656_v29 }
 0x6a6   : > { %v1747_v17 = vpop.permute.xlu0 %1746  ;;  %2022 = vmatprep.subr.bf16.mxu1 %v1663_v20  ;;  %v1749_v23 = vpop.permute.xlu1 %1748  ;;  %v1791_v7 = vpack.c.bf16 %v1785_v42, %v1783_v53  ;;  %v1790_v60 = vpack.c.bf16 %v1784_v55, %v1782_v9 }
 0x6a7   : > { %v1753_v39 = vsel %vm703_vm5, %v1747_v17, %v1749_v23  ;;  %v1769_v18 = vsel %vm703_vm5, %v1749_v23, %v1747_v17 }
 0x6a8   : > { %v1788_v54 = vmul.f32 %v1775_v1, %v1753_v39  ;;  %v1789_v28 = vmul.f32 %v1779_v3, %v1769_v18  ;;  %v2736_v39 = vld [vmem:[%s3668_s4 + $0x18] ss:$12 sps:$4 sm:$0xff]  }
 0x6a9   : > { %2023 = vmatpush1.bf16.msra.mxu1 %v1662_v14 }
 0x6aa   : > { %v1799_v41 = vpop.permute.xlu0 %1798  ;;  %2024 = vmatprep.subr.bf16.mxu1 %v1665_v37  ;;  %v1801_v43 = vpop.permute.xlu1 %1800 }
 0x6ab   : > { %v1830_v29 = vsel %vm769_vm6, %v1801_v43, %v1799_v41  ;;  %v1814_v17 = vsel %vm769_vm6, %v1799_v41, %v1801_v43 }
 0x6ac   : > { %v1847_v23 = vmul.f32 %v1843_v21, %v1830_v29 }
 0x6ad   : > { %2025 = vmatpush1.bf16.msra.mxu1 %v1664_v10 }
 0x6ae   : > { %v1679_v19 = vpop.permute.xlu0 %1678  ;;  %2026 = vmatprep.subr.bf16.mxu1 %v1727_v32  ;;  %v1681_v44 = vpop.permute.xlu1 %1680 }
 0x6af   : > { %v1688_v61 = vsel %vm637_vm4, %v1679_v19, %v1681_v44  ;;  %v1704_v4 = vsel %vm637_vm4, %v1681_v44, %v1679_v19 }
 0x6b0   : > { %v1722_v5 = vmul.f32 %v1711_v63, %v1688_v61  ;;  %v1723_v48 = vmul.f32 %v1715_v35, %v1704_v4  ;;  %v1839_v35 = vrot.slane %v2546_v47, %v2996_v13 }
 0x6b1   : > { %2027 = vmatpush1.bf16.msra.mxu1 %v1726_v58  ;;  %v2547_v58 = vld [vmem:[%s3672_s8 + $0x10] ss:$8 sm:$0x3] }
 0x6b2   : > { %v1728_v8 = vpack.c.bf16 %v1724_v45, %v1722_v5  ;;  %v1803_v15 = vpop.permute.xlu0 %1802  ;;  %v1805_v16 = vpop.permute.xlu1 %1804  ;;  %v1729_v62 = vpack.c.bf16 %v1725_v40, %v1723_v48  ;;  %v1846_v38 = vmul.f32 %v1839_v35, %v1814_v17  ;;  %v1903_v44 = vrot.slane %v2547_v58, %v2996_v13  ;;  %v2734_v40 = vld [vmem:[%s3668_s4 + $0x1c] ss:$12 sps:$4 sm:$0xff]  }
 0x6b3   : > { %v1831_v59 = vsel %vm769_vm6, %v1805_v16, %v1803_v15  ;;  %v1815_v6 = vsel %vm769_vm6, %v1803_v15, %v1805_v16  ;;  %v1907_v45 = vrot.slane %v2547_v58, %v2987_v11 }
 0x6b4   : > { %2028 = vmatprep.subr.bf16.mxu1 %v1729_v62  ;;  %v1849_v27 = vmul.f32 %v1843_v21, %v1831_v59  ;;  %v1848_v36 = vmul.f32 %v1839_v35, %v1815_v6 }
 0x6b5   : > { %2029 = vmatpush1.bf16.msra.mxu1 %v1728_v8 }
 0x6b6   : > { %v1743_v24 = vpop.permute.xlu0 %1742  ;;  %2030 = vmatprep.subr.bf16.mxu1 %v1791_v7  ;;  %v1745_v25 = vpop.permute.xlu1 %1744  ;;  %v1855_v37 = vpack.c.bf16 %v1849_v27, %v1847_v23  ;;  %v1854_v57 = vpack.c.bf16 %v1848_v36, %v1846_v38  ;;  %v2124_v36 = vld [vmem:[%s3671_s7] sm:$0xff] }
 0x6b7   : > { %v1752_v26 = vsel %vm703_vm5, %v1743_v24, %v1745_v25  ;;  %v1768_v51 = vsel %vm703_vm5, %v1745_v25, %v1743_v24  ;;  %2636 = vmatprep.mubr.msk.f32.mxu0 %vm959_vm8, %v2124_v36 }
 0x6b8   : > { %v1786_v20 = vmul.f32 %v1775_v1, %v1752_v26  ;;  %v1787_v33 = vmul.f32 %v1779_v3, %v1768_v51  ;;  %v2737_v26 = vld [vmem:[%s3668_s4 + $0x8] ss:$12 sps:$4 sm:$0xff]   ;;  %v2738_v51 = vld [vmem:[%s3668_s4 + $0x20] ss:$12 sps:$4 sm:$0xff]  }
 0x6b9   : > { %2031 = vmatpush1.bf16.msra.mxu1 %v1790_v60 }
 0x6ba   : > { %v1792_v50 = vpack.c.bf16 %v1788_v54, %v1786_v20  ;;  %v1811_v52 = vpop.permute.xlu0 %1810  ;;  %v1813_v14 = vpop.permute.xlu1 %1812  ;;  %v1793_v63 = vpack.c.bf16 %v1789_v28, %v1787_v33 }
 0x6bb   : > { %v1817_v0 = vsel %vm769_vm6, %v1811_v52, %v1813_v14  ;;  %v1833_v2 = vsel %vm769_vm6, %v1813_v14, %v1811_v52 }
 0x6bc   : > { %2032 = vmatprep.subr.bf16.mxu1 %v1793_v63  ;;  %v1852_v31 = vmul.f32 %v1839_v35, %v1817_v0  ;;  %v1853_v32 = vmul.f32 %v1843_v21, %v1833_v2 }
 0x6bd   : > { %2033 = vmatpush1.bf16.msra.mxu1 %v1792_v50 }
 0x6be   : > { %v1807_v12 = vpop.permute.xlu0 %1806  ;;  %2034 = vmatprep.subr.bf16.mxu1 %v1855_v37  ;;  %v1809_v10 = vpop.permute.xlu1 %1808 }
 0x6bf   : > { %v1816_v41 = vsel %vm769_vm6, %v1807_v12, %v1809_v10  ;;  %v1832_v43 = vsel %vm769_vm6, %v1809_v10, %v1807_v12 }
 0x6c0   : > { %v1850_v34 = vmul.f32 %v1839_v35, %v1816_v41  ;;  %v1851_v56 = vmul.f32 %v1843_v21, %v1832_v43  ;;  %v2126_v41 = vld [vmem:[%s3671_s7 + $0x10] sm:$0xff]  ;;  %v2127_v43 = vld [vmem:[%s3671_s7 + $0x18] sm:$0xff] }
 0x6c1   : > { %2035 = vmatpush1.bf16.msra.mxu1 %v1854_v57  ;;  %v2125_v57 = vld [vmem:[%s3671_s7 + $0x8] sm:$0xff] }
 0x6c2   : > { %v1856_v1 = vpack.c.bf16 %v1852_v31, %v1850_v34  ;;  %v1863_v3 = vpop.permute.xlu0 %1862  ;;  %v1865_v30 = vpop.permute.xlu1 %1864  ;;  %v1857_v19 = vpack.c.bf16 %v1853_v32, %v1851_v56 }
 0x6c3   : > { %v1878_v61 = vsel %vm835_vm7, %v1863_v3, %v1865_v30  ;;  %v1894_v4 = vsel %vm835_vm7, %v1865_v30, %v1863_v3 }
 0x6c4   : > { %2036 = vmatprep.subr.bf16.mxu1 %v1857_v19  ;;  %v1910_v48 = vmul.f32 %v1903_v44, %v1878_v61  ;;  %v1911_v49 = vmul.f32 %v1907_v45, %v1894_v4 }
 0x6c5   : > { %2037 = vmatpush1.bf16.msra.mxu1 %v1856_v1 }
 0x6c6   : > { %v1867_v42 = vpop.permute.xlu0 %1866  ;;  %v1869_v5 = vpop.permute.xlu1 %1868 }
 0x6c7   : > { %v1879_v13 = vsel %vm835_vm7, %v1867_v42, %v1869_v5  ;;  %v1895_v11 = vsel %vm835_vm7, %v1869_v5, %v1867_v42 }
 0x6c8   : > { %v1912_v53 = vmul.f32 %v1903_v44, %v1879_v13  ;;  %v1913_v55 = vmul.f32 %v1907_v45, %v1895_v11  ;;  %2039 = vmatmul.mubr.bf16.vlgmr.msra.gmra.mrb[8].mxu1 %v2731_v46 }
 0x6c9   : > { %2048 = vmatprep.mubr.bf16.mxu1 %v2734_v40 }
 0x6ca   : > { %v1918_v8 = vpack.c.bf16 %v1912_v53, %v1910_v48  ;;  %v1871_v15 = vpop.permute.xlu0 %1870  ;;  %v1873_v16 = vpop.permute.xlu1 %1872  ;;  %v1919_v62 = vpack.c.bf16 %v1913_v55, %v1911_v49 }
 0x6cb   : > { %v1880_v47 = vsel %vm835_vm7, %v1871_v15, %v1873_v16  ;;  %v1896_v9 = vsel %vm835_vm7, %v1873_v16, %v1871_v15 }
 0x6cc   : > { %2059 = vmatprep.subr.bf16.mxu1 %v1919_v62  ;;  %v1914_v54 = vmul.f32 %v1903_v44, %v1880_v47  ;;  %v1915_v21 = vmul.f32 %v1907_v45, %v1896_v9  ;;  %v2399_v47 = vld [vmem:[%s3670_s6 + $0x8] sm:$0xff]  ;;  %v2398_v9 = vld [vmem:[%s3670_s6] sm:$0xff] }
 0x6cd   : > { %2060 = vmatpush1.bf16.msra.mxu1 %v1918_v8 }
 0x6ce   : > { %v1875_v18 = vpop.permute.xlu0 %1874  ;;  %v1877_v7 = vpop.permute.xlu1 %1876 }
 0x6cf   : > { %v1881_v59 = vsel %vm835_vm7, %v1875_v18, %v1877_v7  ;;  %v1897_v60 = vsel %vm835_vm7, %v1877_v7, %v1875_v18 }
 0x6d0   : > { %v1916_v24 = vmul.f32 %v1903_v44, %v1881_v59  ;;  %v1917_v25 = vmul.f32 %v1907_v45, %v1897_v60  ;;  %2049 = vmatmul.mubr.bf16.gmra.mrb[12].mxu1 %v2736_v39 }
 0x6d1   : > { %2091 = vmatprep.mubr.bf16.mxu1 %v2779_v22 }
 0x6d2   : > { %v1920_v28 = vpack.c.bf16 %v1916_v24, %v1914_v54  ;;  %v1921_v29 = vpack.c.bf16 %v1917_v25, %v1915_v21 }
 0x6d4   : > { %2061 = vmatprep.subr.bf16.mxu1 %v1921_v29 }
 0x6d5   : > { %2062 = vmatpush1.bf16.msra.mxu1 %v1920_v28 }
 0x6d8   : > { %2554 = vmatmul.mubr.msk.bf16.vlgmr.msra.gmra.mrb[8].mxu1 %vm959_vm8, %v2737_v26 }
 0x6d9   : > { %2101 = vmatprep.mubr.bf16.mxu1 %v2779_v22 }
 0x6e0   : > { %2555 = vmatmul.mubr.msk.bf16.gmra.mrb[12].mxu1 %vm959_vm8, %v2738_v51 }
 0x7ab   : > { %v2093_v6 = vpop.f32.mrb[8].mxu1 }
 0x7ac   : > { %v2095_v27 = vpop.f32.mrb[9].mxu1 }
 0x7ad   : > { %v2112_v20 = vadd.f32 %v2095_v27, %v2093_v6  ;;  %v2097_v33 = vpop.f32.mrb[10].mxu1 }
 0x7ae   : > { %v2099_v35 = vpop.f32.mrb[11].mxu1 }
 0x7af   : > { %v2115_v17 = vadd.f32 %v2099_v35, %v2097_v33  ;;  %2113 = vadd.xlane.f32.xlu0 %v2112_v20  ;;  %v2363_v20 = vld [vmem:[%s3669_s5 + $0x8] sm:$0xff] }
 0x7b1   : > { %2116 = vadd.xlane.f32.xlu1 %v2115_v17 }
 0x7b3   : > { %v2103_v23 = vpop.f32.mrb[12].mxu1 }
 0x7b4   : > { %v2105_v50 = vpop.f32.mrb[13].mxu1 }
 0x7b5   : > { %v2118_v52 = vadd.f32 %v2105_v50, %v2103_v23  ;;  %v2107_v14 = vpop.f32.mrb[14].mxu1 }
 0x7b6   : > { %v2109_v63 = vpop.f32.mrb[15].mxu1 }
 0x7b7   : > { %v2121_v22 = vadd.f32 %v2109_v63, %v2107_v14  ;;  %2119 = vadd.xlane.f32.xlu0 %v2118_v52  ;;  %v2365_v52 = vld [vmem:[%s3669_s5 + $0x18] sm:$0xff] }
 0x7bb   : > { %2122 = vadd.xlane.f32.xlu0 %v2121_v22 }
 0x83c   : > { %v2114_v37 = vpop.xlane.xlu0 %2113 }
 0x83e   : > { %v2117_v38 = vpop.xlane.xlu1 %2116 }
 0x83f   : > { %v2672_v0 = vpack.c.bf16 %v2117_v38, %v2114_v37  ;;  %v2364_v37 = vld [vmem:[%s3669_s5 + $0x10] sm:$0xff] }
 0x841   : > { %2673 = vmatprep.subr.bf16.mxu0 %v2672_v0 }
 0x842   : > { %2675 = vmatpush3.bf16.msra.mxu0 %v2672_v0  ;;  %v2401_v0 = vld [vmem:[%s3670_s6 + $0x18] sm:$0xff] }
 0x844   : > { %v2120_v2 = vpop.xlane.xlu0 %2119 }
 0x848   : > { %v2123_v12 = vpop.xlane.xlu0 %2122 }
 0x849   : > { %v2676_v10 = vpack.c.bf16 %v2123_v12, %v2120_v2 }
 0x84b   : > { %2677 = vmatprep.subr.bf16.mxu0 %v2676_v10 }
 0x84c   : > { %2679 = vmatpush3.bf16.msra.mxu0 %v2676_v10 }
 0x84f   : > { %2637 = vmatmul.mubr.msk.f32.vlgmr.msra.gmra.mrb[8].mxu0 %vm959_vm8, %v2125_v57 }
 0x850   : > { %2639 = vmatprep.mubr.msk.f32.mxu0 %vm959_vm8, %v2126_v41 }
 0x853   : > { %2640 = vmatmul.mubr.msk.f32.gmra.mrb[10].mxu0 %vm959_vm8, %v2127_v43 }
 0x854   : > { %2650 = vmatprep.mubr.msk.f32.mxu0 %vm959_vm8, %v2124_v36 }
 0x922   : > { %v2638_v31 = vpop.f32.mrb[8].mxu0 }
 0x923   : > { %2232 = vperm.xlu0 %2721, %v2638_v31   ;;  %v2206_v32 = vpop.f32.mrb[9].mxu0 }
 0x924   : > { %2227 = vperm.xlu1 %2722, %v2206_v32  }
 0x926   : > { %v2641_v34 = vpop.f32.mrb[10].mxu0 }
 0x927   : > { %v2216_v56 = vpop.f32.mrb[11].mxu0 }
 0x928   : > { %2237 = vperm.xlu1 %2722, %v2216_v56  }
 0x92c   : > { %2242 = vperm.xlu1 %2722, %v2641_v34  }
 0x9a2   : > { %v2233_v58 = vpop.permute.xlu0 %2232 }
 0x9a3   : > { %v3571_v1 = vsub.f32 %v2097_v33, %v2233_v58  ;;  %v3573_v3 = vsub.f32 %v2099_v35, %v2233_v58  ;;  %v2228_v30 = vpop.permute.xlu1 %2227  ;;  %v2362_v33 = vld [vmem:[%s3669_s5] sm:$0xff] }
 0x9a4   : > { %v3575_v19 = vsub.f32 %v2093_v6, %v2228_v30  ;;  %v3577_v44 = vsub.f32 %v2095_v27, %v2228_v30 }
 0x9a5   : > { %v2255_v45 = vmul.f32 %v3571_v1, %v3571_v1  ;;  %v2256_v46 = vmul.f32 %v3573_v3, %v3573_v3 }
 0x9a6   : > { %v2253_v61 = vmul.f32 %v3575_v19, %v3575_v19  ;;  %v2254_v4 = vmul.f32 %v3577_v44, %v3577_v44 }
 0x9a7   : > { %v2238_v40 = vpop.permute.xlu1 %2237  ;;  %v2264_v42 = vadd.f32 %v2256_v46, %v2255_v45  ;;  %v2755_v45 = vld [vmem:[%s2846_s14 + $0x10] sm:$0xff] }
 0x9a8   : > { %v3587_v5 = vsub.f32 %v2103_v23, %v2238_v40  ;;  %v3589_v13 = vsub.f32 %v2105_v50, %v2238_v40  ;;  %v2261_v11 = vadd.f32 %v2254_v4, %v2253_v61  ;;  %v2756_v61 = vld [vmem:[%s2846_s14 + $0x18] sm:$0xff] }
 0x9a9   : > { %2265 = vadd.xlane.f32.xlu1 %v2264_v42 }
 0x9aa   : > { %v2257_v48 = vmul.f32 %v3587_v5, %v3587_v5  ;;  %v2258_v49 = vmul.f32 %v3589_v13, %v3589_v13  ;;  %2262 = vadd.xlane.f32.xlu0 %v2261_v11 }
 0x9ab   : > { %v2243_v53 = vpop.permute.xlu1 %2242 }
 0x9ac   : > { %v3595_v55 = vsub.f32 %v2107_v14, %v2243_v53  ;;  %v3597_v8 = vsub.f32 %v2109_v63, %v2243_v53  ;;  %v2267_v15 = vadd.f32 %v2258_v49, %v2257_v48  ;;  %v2400_v63 = vld [vmem:[%s3670_s6 + $0x10] sm:$0xff] }
 0x9ae   : > { %v2259_v16 = vmul.f32 %v3595_v55, %v3595_v55  ;;  %v2260_v62 = vmul.f32 %v3597_v8, %v3597_v8  ;;  %2268 = vadd.xlane.f32.xlu0 %v2267_v15 }
 0x9b0   : > { %v2270_v39 = vadd.f32 %v2260_v62, %v2259_v16 }
 0x9b2   : > { %2271 = vadd.xlane.f32.xlu0 %v2270_v39 }
 0x9ba   : > { %2409 = vperm.xlu1 %2722, %v2399_v47  }
 0x9c8   : > { %2404 = vperm.xlu0 %2721, %v2398_v9  }
 0xa36   : > { %v2266_v18 = vpop.xlane.xlu1 %2265 }
 0xa37   : > { %v2263_v7 = vpop.xlane.xlu0 %2262 }
 0xa38   : > { %v2680_v59 = vpack.c.bf16 %v2266_v18, %v2263_v7 }
 0xa3a   : > { %2681 = vmatprep.subr.bf16.mxu0 %v2680_v59  ;;  %v2410_v12 = vpop.permute.xlu1 %2409 }
 0xa3b   : > { %v2269_v60 = vpop.xlane.xlu0 %2268  ;;  %2683 = vmatpush3.bf16.msra.mxu0 %v2680_v59  ;;  %v2759_v59 = vld [vmem:[%s2846_s14 + $0x20] sm:$0xff] }
 0xa3f   : > { %v2272_v54 = vpop.xlane.xlu0 %2271 }
 0xa40   : > { %v2684_v21 = vpack.c.bf16 %v2272_v54, %v2269_v60  ;;  %v2760_v54 = vld [vmem:[%s2846_s14 + $0x28] sm:$0xff] }
 0xa42   : > { %2685 = vmatprep.subr.bf16.mxu0 %v2684_v21 }
 0xa43   : > { %2687 = vmatpush3.bf16.msra.mxu0 %v2684_v21 }
 0xa46   : > { %2651 = vmatmul.mubr.msk.f32.vlgmr.msra.gmra.mrb[12].mxu0 %vm959_vm8, %v2125_v57 }
 0xa47   : > { %2653 = vmatprep.mubr.msk.f32.mxu0 %vm959_vm8, %v2126_v41  ;;  %v2405_v2 = vpop.permute.xlu0 %2404 }
 0xa4a   : > { %2654 = vmatmul.mubr.msk.f32.gmra.mrb[14].mxu0 %vm959_vm8, %v2127_v43 }
 0xb19   : > { %v2652_v24 = vpop.f32.mrb[12].mxu0 }
 0xb1a   : > { %v2345_v25 = vadd.f32 1e-05, %v2652_v24  ;;  %v2339_v28 = vpop.f32.mrb[13].mxu0 }
 0xb1b   : > { %v2340_v29 = vadd.f32 1e-05, %v2339_v28  ;;  %v2761_v28 = vld [vmem:[%s2846_s14 + $0x30] sm:$0xff] }
 0xb1c   : > { %2747 = vrsqrt.f32 %v2345_v25 }
 0xb1d   : > { %2749 = vrsqrt.f32 %v2340_v29  ;;  %v2655_v26 = vpop.f32.mrb[14].mxu0 }
 0xb1e   : > { %v2355_v51 = vadd.f32 1e-05, %v2655_v26  ;;  %v2349_v6 = vpop.f32.mrb[15].mxu0 }
 0xb1f   : > { %v2350_v27 = vadd.f32 1e-05, %v2349_v6 }
 0xb20   : > { %2751 = vrsqrt.f32 %v2355_v51 }
 0xb21   : > { %2753 = vrsqrt.f32 %v2350_v27 }
 0xb26   : > { %v2748_v35 = vpop.eup %2747 }
 0xb27   : > { %v2750_v17 = vpop.eup %2749  ;;  %v2367_v23 = vmul.f32 %v2748_v35, %v2363_v20 }
 0xb28   : > { %v2366_v50 = vmul.f32 %v2750_v17, %v2362_v33 }
 0xb29   : > { %2377 = vperm.xlu0 %2721, %v2367_v23  }
 0xb2a   : > { %v2752_v14 = vpop.eup %2751  ;;  %2372 = vperm.xlu1 %2722, %v2366_v50  }
 0xb2b   : > { %v2369_v22 = vmul.f32 %v2752_v14, %v2365_v52  ;;  %v2754_v36 = vpop.eup %2753 }
 0xb2c   : > { %v2368_v38 = vmul.f32 %v2754_v36, %v2364_v37 }
 0xb2d   : > { %2414 = vperm.xlu0 %2721, %v2400_v63  }
 0xb2e   : > { %2387 = vperm.xlu1 %2722, %v2369_v22  }
 0xb32   : > { %2382 = vperm.xlu1 %2722, %v2368_v38  }
 0xb36   : > { %2419 = vperm.xlu1 %2722, %v2401_v0  }
 0xba8   : > { %v2378_v10 = vpop.permute.xlu0 %2377 }
 0xba9   : > { %v2392_v57 = vmul.f32 %v2378_v10, %v3571_v1  ;;  %v2393_v41 = vmul.f32 %v2378_v10, %v3573_v3  ;;  %v2373_v43 = vpop.permute.xlu1 %2372  ;;  %v2757_v1 = vld [vmem:[%s2846_s14] sm:$0xff] }
 0xbaa   : > { %v2390_v31 = vmul.f32 %v2373_v43, %v3575_v19  ;;  %v2391_v32 = vmul.f32 %v2373_v43, %v3577_v44  ;;  %v2758_v19 = vld [vmem:[%s2846_s14 + $0x8] sm:$0xff] }
 0xbab   : > { %v2424_v34 = vadd.f32 %v2410_v12, %v2392_v57  ;;  %v2425_v56 = vadd.f32 %v2410_v12, %v2393_v41 }
 0xbac   : > { %v2422_v58 = vadd.f32 %v2405_v2, %v2390_v31  ;;  %v2423_v30 = vadd.f32 %v2405_v2, %v2391_v32  ;;  %v2415_v62 = vpop.permute.xlu0 %2414 }
 0xbad   : > { %v2432_v46 = vadd.f32 %v2755_v45, %v2424_v34  ;;  %v2433_v4 = vadd.f32 %v2756_v61, %v2425_v56  ;;  %v2388_v40 = vpop.permute.xlu1 %2387 }
 0xbae   : > { %v2430_v3 = vadd.f32 %v2757_v1, %v2422_v58  ;;  %v2431_v44 = vadd.f32 %v2758_v19, %v2423_v30  ;;  %v2396_v39 = vmul.f32 %v2388_v40, %v3595_v55  ;;  %v2397_v47 = vmul.f32 %v2388_v40, %v3597_v8  ;;  %v2762_v55 = vld [vmem:[%s2846_s14 + $0x38] sm:$0xff] }
 0xbaf   : > { %v2440_v42 = vmax.f32 %v2432_v46, 0.0  ;;  %v2441_v11 = vmax.f32 %v2433_v4, 0.0 }
 0xbb0   : > { %v2438_v48 = vmax.f32 %v2430_v3, 0.0  ;;  %v2439_v49 = vmax.f32 %v2431_v44, 0.0 }
 0xbb1   : > { %2448 = vst [vmem:[%s3641_s18 + $0x10] sm:$0xff] %v2440_v42  ;;  %2449 = vst [vmem:[%s3641_s18 + $0x18] sm:$0xff] %v2441_v11  ;;  %v2383_v53 = vpop.permute.xlu1 %2382 }
 0xbb2   : > { %2446 = vst [vmem:[%s3641_s18] sm:$0xff] %v2438_v48  ;;  %2447 = vst [vmem:[%s3641_s18 + $0x8] sm:$0xff] %v2439_v49  ;;  %v2394_v15 = vmul.f32 %v2383_v53, %v3587_v5  ;;  %v2395_v16 = vmul.f32 %v2383_v53, %v3589_v13 }
 0xbb4   : > { %v2426_v9 = vadd.f32 %v2415_v62, %v2394_v15  ;;  %v2427_v18 = vadd.f32 %v2415_v62, %v2395_v16 }
 0xbb5   : > { %v2420_v7 = vpop.permute.xlu1 %2419 }
 0xbb6   : > { %v2434_v60 = vadd.f32 %v2759_v59, %v2426_v9  ;;  %v2435_v5 = vadd.f32 %v2760_v54, %v2427_v18  ;;  %v2428_v21 = vadd.f32 %v2420_v7, %v2396_v39  ;;  %v2429_v24 = vadd.f32 %v2420_v7, %v2397_v47 }
 0xbb8   : > { %v2442_v13 = vmax.f32 %v2434_v60, 0.0  ;;  %v2443_v25 = vmax.f32 %v2435_v5, 0.0  ;;  %v2436_v29 = vadd.f32 %v2761_v28, %v2428_v21  ;;  %v2437_v26 = vadd.f32 %v2762_v55, %v2429_v24 }
 0xbba   : > { %2450 = vst [vmem:[%s3641_s18 + $0x20] sm:$0xff] %v2442_v13  ;;  %2451 = vst [vmem:[%s3641_s18 + $0x28] sm:$0xff] %v2443_v25  ;;  %v2444_v8 = vmax.f32 %v2436_v29, 0.0  ;;  %v2445_v51 = vmax.f32 %v2437_v26, 0.0 }
 0xbbc   : > { %2452 = vst [vmem:[%s3641_s18 + $0x30] sm:$0xff] %v2444_v8  ;;  %2453 = vst [vmem:[%s3641_s18 + $0x38] sm:$0xff] %v2445_v51 }
 0xbbd PF: > { %s19_s30 = sadd.s32 1, %s2769_s30  }
 0xbbe   : > { %p16_p4 = scmp.ge.s32.totalorder %s19_s30, 4  }
 0xbc0   :  { %18 = sbr.rel (!%p16_p4) target bundleno = 1 (0x1), region = 93 }

</bundles_post_ra>
